<compile_context>
chip_gen: v7x
topology: tpu7x:2x2x1
jax: 0.10.0
libtpu: 0.0.40
codegen_flags: <defaults>
</compile_context>

<pallas_src>
import math
import functools

import jax
import jax.numpy as jnp
from jax import lax
from jax.experimental import pallas as pl
from jax.experimental.pallas import tpu as pltpu

# Finite "minus infinity": keeps exp()/max() NaN-free even when a class tile is
# entirely padding (possible for the last tile of the last class split).
_NEG = -1.0e30


def _round_up(v, m):
    return ((v + m - 1) // m) * m


def _aam_kernel(x_ref, w_ref, lab_ref,
                mrow_ref, lrow_ref, trow_ref, prow_ref,
                xn_ref, m_ref, l_ref, t_ref, pred_ref, *,
                cos_m, sin_m, th, mm, scale, n_classes, tile_c,
                tiles_per_split, mask_classes):
    s = pl.program_id(0)          # class split (leading parallel axis)
    ci = pl.program_id(2)         # class tile within split (reduction axis)
    n_ci = pl.num_programs(2)
    eps = 1e-12

    # ---- once per (split, batch tile): normalize x (EUP rsqrt), init accumulators ----
    @pl.when(ci == 0)
    def _init():
        x = x_ref[...].astype(jnp.float32)
        # x / max(||x||, eps)  ==  x * rsqrt(max(||x||^2, eps^2))
        inv = lax.rsqrt(jnp.maximum(jnp.sum(x * x, axis=-1, keepdims=True),
                                    eps * eps))
        xn_ref[...] = (x * inv).astype(xn_ref.dtype)
        m_ref[...] = jnp.full_like(m_ref, _NEG)
        l_ref[...] = jnp.zeros_like(l_ref)
        t_ref[...] = jnp.zeros_like(t_ref)
        pred_ref[...] = jnp.zeros_like(pred_ref)

    # ---- MXU: cosine = x_n @ w_n ; weight already normalized / transposed / bf16 ----
    cosine = jnp.dot(xn_ref[...], w_ref[...],
                     preferred_element_type=jnp.float32)    # (tile_b, tile_c) f32

    lab = lab_ref[...]                                       # (tile_b, 1) int32
    col0 = (s * tiles_per_split + ci) * tile_c
    col = col0 + lax.broadcasted_iota(jnp.int32, cosine.shape, 1)
    is_target = col == lab                                   # (tile_b, tile_c)

    # ---- per-row margin math: phi only ever touches one column per row ----
    cos_t = jnp.sum(jnp.where(is_target, cosine, 0.0), axis=-1, keepdims=True)
    has_t = (lab >= col0) & (lab < col0 + tile_c)            # (tile_b, 1)
    sin_t = jnp.sqrt(jnp.clip(1.0 - cos_t * cos_t, 0.0, 1.0))
    phi_t = cos_t * cos_m - sin_t * sin_m
    phi_t = jnp.where(cos_t - th > 0.0, phi_t, cos_t - mm)
    tgt_logit = scale * phi_t                                # (tile_b, 1)

    # Blend + padded-class mask fused into the single live full-tile logits array.
    if mask_classes:
        base = jnp.where(col < n_classes, scale * cosine, _NEG)
    else:
        base = scale * cosine
    out = jnp.where(is_target, tgt_logit, base)              # (tile_b, tile_c)

    # ---- online logsumexp / target-logit / argmax accumulation ----
    m_old = m_ref[...]
    tile_max = jnp.max(out, axis=-1, keepdims=True)
    m_new = jnp.maximum(m_old, tile_max)
    alpha = jnp.exp(m_old - m_new)
    l_ref[...] = l_ref[...] * alpha + jnp.sum(jnp.exp(out - m_new),
                                              axis=-1, keepdims=True)
    m_ref[...] = m_new
    t_ref[...] = t_ref[...] + jnp.where(has_t, tgt_logit, 0.0)

    big = jnp.int32(2 ** 30)
    tile_arg = jnp.min(jnp.where(out >= tile_max, col, big),
                       axis=-1, keepdims=True)               # lowest idx of tile max
    pred_ref[...] = jnp.where(tile_max > m_old, tile_arg, pred_ref[...])

    # ---- finalize: lane-dense partial row slabs (merged by tiny XLA epilogue) ----
    @pl.when(ci == n_ci - 1)
    def _fin():
        tb = m_ref.shape[0]
        mrow_ref[...] = jnp.broadcast_to(m_ref[...].reshape(1, tb, 1), mrow_ref.shape)
        lrow_ref[...] = jnp.broadcast_to(l_ref[...].reshape(1, tb, 1), lrow_ref.shape)
        trow_ref[...] = jnp.broadcast_to(t_ref[...].reshape(1, tb, 1), trow_ref.shape)
        prow_ref[...] = jnp.broadcast_to(pred_ref[...].reshape(1, tb, 1), prow_ref.shape)


def aam_softmax_forward(x, weight, label, *, margin, scale,
                        tile_b=None, tile_c=1024, class_splits=None,
                        mxu_dtype=jnp.bfloat16):
    """Pallas implementation of AAMsoftmax.forward -> (loss, prec1)."""
    batch, n_out = x.shape
    n_classes, n_out_w = weight.shape
    assert n_out_w == n_out
    eps = 1e-12

    nout_pad = _round_up(n_out, 128)
    sub = 16 if jnp.dtype(mxu_dtype) == jnp.dtype(jnp.bfloat16) else 8
    if tile_b is None:
        tile_b = min(256, _round_up(batch, sub))
    else:
        tile_b = max(_round_up(tile_b, sub), sub)
    b_pad = _round_up(batch, tile_b)
    b_tiles = b_pad // tile_b

    tile_c = min(_round_up(tile_c, 128), _round_up(n_classes, 128))
    c_tiles = pl.cdiv(n_classes, tile_c)
    if class_splits is None:
        # Engage the 2nd TensorCore (v7x) when one batch tile would otherwise make
        # the "parallel" batch axis trivial; harmless (serial) on 1-TC chips.
        class_splits = 2 if (b_tiles == 1 and c_tiles >= 2) else 1
    c_tiles = _round_up(c_tiles, class_splits)
    tiles_per_split = c_tiles // class_splits
    c_pad = c_tiles * tile_c
    mask_classes = c_pad > n_classes

    # One fused wrapper pass over W: normalize rows, cast to MXU dtype (bf16 halves
    # the streamed HBM bytes), transpose to (nOut, nClasses) so the kernel matmul is
    # a plain (M,K)x(K,N) contraction (no in-kernel transpose), zero-pad.
    w32 = weight.astype(jnp.float32)
    w_inv = lax.rsqrt(jnp.maximum(jnp.sum(w32 * w32, axis=-1, keepdims=True),
                                  eps * eps))
    w_n = (w32 * w_inv).astype(mxu_dtype)
    wp = jnp.zeros((nout_pad, c_pad), mxu_dtype).at[:n_out, :n_classes].set(w_n.T)

    xp = jnp.zeros((b_pad, nout_pad), jnp.float32).at[:batch, :n_out].set(
        x.astype(jnp.float32))
    labp = jnp.zeros((b_pad, 1), jnp.int32).at[:batch, 0].set(label.astype(jnp.int32))

    kernel = functools.partial(
        _aam_kernel,
        cos_m=math.cos(margin), sin_m=math.sin(margin),
        th=math.cos(math.pi - margin), mm=math.sin(math.pi - margin) * margin,
        scale=float(scale), n_classes=n_classes, tile_c=tile_c,
        tiles_per_split=tiles_per_split, mask_classes=mask_classes)

    grid = (class_splits, b_tiles, tiles_per_split)
    row_shape = (class_splits, b_pad, 128)
    row_spec = pl.BlockSpec((1, tile_b, 128), lambda s, bi, ci: (s, bi, 0))

    m_rows, l_rows, t_rows, pred_rows = pl.pallas_call(
        kernel,
        out_shape=(jax.ShapeDtypeStruct(row_shape, jnp.float32),
                   jax.ShapeDtypeStruct(row_shape, jnp.float32),
                   jax.ShapeDtypeStruct(row_shape, jnp.float32),
                   jax.ShapeDtypeStruct(row_shape, jnp.int32)),
        grid_spec=pltpu.PrefetchScalarGridSpec(
            num_scalar_prefetch=0,
            grid=grid,
            in_specs=[
                pl.BlockSpec((tile_b, nout_pad), lambda s, bi, ci: (bi, 0)),      # x
                pl.BlockSpec((nout_pad, tile_c),                                   # W^T
                             lambda s, bi, ci: (0, s * tiles_per_split + ci)),
                pl.BlockSpec((tile_b, 1), lambda s, bi, ci: (bi, 0)),              # labels
            ],
            out_specs=(row_spec, row_spec, row_spec, row_spec),
            scratch_shapes=[
                pltpu.VMEM((tile_b, nout_pad), mxu_dtype),   # cached normalized x
                pltpu.VMEM((tile_b, 1), jnp.float32),        # running max
                pltpu.VMEM((tile_b, 1), jnp.float32),        # running sum-exp
                pltpu.VMEM((tile_b, 1), jnp.float32),        # target logit
                pltpu.VMEM((tile_b, 1), jnp.int32),          # running argmax
            ]),
        compiler_params=pltpu.CompilerParams(
            dimension_semantics=("parallel", "parallel", "arbitrary"),
            vmem_limit_bytes=48 * 1024 * 1024),
    )(xp, wp, labp)

    # ---- tiny XLA epilogue: drop padded rows, merge split partials, reduce ----
    label_i = label.astype(jnp.int32)
    m_s = m_rows[:, :batch, 0]          # (S, B)
    l_s = l_rows[:, :batch, 0]
    t_s = t_rows[:, :batch, 0]
    p_s = pred_rows[:, :batch, 0]

    m_tot = jnp.max(m_s, axis=0)
    l_tot = jnp.sum(l_s * jnp.exp(m_s - m_tot[None, :]), axis=0)
    lse = m_tot + jnp.log(l_tot)
    t_tot = jnp.sum(t_s, axis=0)
    loss = jnp.mean(lse - t_tot)

    best = jnp.argmax(m_s, axis=0)      # first-occurrence ⇒ lowest class range on ties
    pred = jnp.take_along_axis(p_s, best[None, :], axis=0)[0]
    prec1 = jnp.mean((pred == label_i).astype(jnp.float32)) * 100.0
    return loss, prec1


def _reference_forward(x, weight, label, *, margin, scale):
    """Pure-JAX reference (mirrors the PyTorch module) for validation."""
    cos_m, sin_m = math.cos(margin), math.sin(margin)
    th = math.cos(math.pi - margin)
    mm = math.sin(math.pi - margin) * margin
    eps = 1e-12
    x_n = x / jnp.maximum(jnp.linalg.norm(x, axis=-1, keepdims=True), eps)
    w_n = weight / jnp.maximum(jnp.linalg.norm(weight, axis=-1, keepdims=True), eps)
    cosine = x_n @ w_n.T
    sine = jnp.sqrt(jnp.clip(1.0 - cosine * cosine, 0.0, 1.0))
    phi = cosine * cos_m - sine * sin_m
    phi = jnp.where(cosine - th > 0.0, phi, cosine - mm)
    one_hot = jax.nn.one_hot(label, cosine.shape[1], dtype=cosine.dtype)
    output = (one_hot * phi + (1.0 - one_hot) * cosine) * scale
    logp = jax.nn.log_softmax(output, axis=-1)
    loss = -jnp.mean(jnp.take_along_axis(logp, label[:, None], axis=1))
    pred = jnp.argmax(output, axis=-1)
    prec1 = jnp.mean((pred == label).astype(jnp.float32)) * 100.0
    return loss, prec1


if __name__ == "__main__":
    # Small but structure-exercising shapes: non-multiple-of-8 batch,
    # non-multiple-of-128 feature dim and class count (padding + masking paths),
    # several class tiles (streaming logsumexp), class-split merge, multi batch tile.
    B, N_OUT, N_CLASSES = 10, 192, 1000
    MARGIN, SCALE = 0.2, 30

    key = jax.random.PRNGKey(0)
    kx, kw, kl = jax.random.split(key, 3)

    x = jax.random.normal(kx, (B, N_OUT), dtype=jnp.float32)
    # xavier_normal_(gain=1): std = sqrt(2 / (fan_in + fan_out))
    std = math.sqrt(2.0 / (N_CLASSES + N_OUT))
    weight = std * jax.random.normal(kw, (N_CLASSES, N_OUT), dtype=jnp.float32)
    label = jax.random.randint(kl, (B,), 0, N_CLASSES, dtype=jnp.int32)

    ref_loss, ref_prec1 = _reference_forward(x, weight, label,
                                             margin=MARGIN, scale=SCALE)

    # (a) strict f32 path, single class tile (default tile_c).
    loss, prec1 = aam_softmax_forward(x, weight, label, margin=MARGIN, scale=SCALE,
                                      mxu_dtype=jnp.float32)
    jax.block_until_ready((loss, prec1))
    assert jnp.allclose(loss, ref_loss, atol=1e-3, rtol=1e-4), (loss, ref_loss)
    assert jnp.allclose(prec1, ref_prec1, atol=1e-4), (prec1, ref_prec1)

    # (b) strict f32 path, several class tiles + auto 2-way class split (v7x layout).
    loss, prec1 = aam_softmax_forward(x, weight, label, margin=MARGIN, scale=SCALE,
                                      tile_c=256, mxu_dtype=jnp.float32)
    jax.block_until_ready((loss, prec1))
    assert jnp.allclose(loss, ref_loss, atol=1e-3, rtol=1e-4), (loss, ref_loss)
    assert jnp.allclose(prec1, ref_prec1, atol=1e-4), (prec1, ref_prec1)

    # (c) strict f32 path, multiple batch tiles + forced single split.
    B2 = 40
    kx2, kl2 = jax.random.split(jax.random.PRNGKey(1))
    x2 = jax.random.normal(kx2, (B2, N_OUT), dtype=jnp.float32)
    label2 = jax.random.randint(kl2, (B2,), 0, N_CLASSES, dtype=jnp.int32)
    ref2 = _reference_forward(x2, weight, label2, margin=MARGIN, scale=SCALE)
    out2 = aam_softmax_forward(x2, weight, label2, margin=MARGIN, scale=SCALE,
                               tile_b=16, tile_c=256, class_splits=1,
                               mxu_dtype=jnp.float32)
    jax.block_until_ready(out2)
    assert jnp.allclose(out2[0], ref2[0], atol=1e-3, rtol=1e-4), (out2[0], ref2[0])
    assert jnp.allclose(out2[1], ref2[1], atol=1e-4), (out2[1], ref2[1])

    # (d) default fast path: bf16 pre-normalized weight streaming + bf16 MXU.
    #     Looser tolerance: bf16 rounding of the unit vectors perturbs cosine ~3e-4.
    loss_bf, prec_bf = aam_softmax_forward(x, weight, label,
                                           margin=MARGIN, scale=SCALE, tile_c=256)
    jax.block_until_ready((loss_bf, prec_bf))
    assert jnp.allclose(loss_bf, ref_loss, atol=5e-2, rtol=1e-2), (loss_bf, ref_loss)

    print("KERNEL_OK")
</pallas_src>

<mosaic_0001>
module attributes {stable_mosaic.version = 11 : i64} {
  func.func @_aam_kernel(%arg0: i32, %arg1: i32, %arg2: i32, %arg3: memref<16x256xf32, #tpu.memory_space<vmem>>, %arg4: memref<256x1024xf32, #tpu.memory_space<vmem>>, %arg5: memref<16x1xi32, #tpu.memory_space<vmem>>, %arg6: memref<1x16x128xf32, #tpu.memory_space<vmem>>, %arg7: memref<1x16x128xf32, #tpu.memory_space<vmem>>, %arg8: memref<1x16x128xf32, #tpu.memory_space<vmem>>, %arg9: memref<1x16x128xi32, #tpu.memory_space<vmem>>, %arg10: memref<16x256xf32, #tpu.memory_space<vmem>>, %arg11: memref<16x1xf32, #tpu.memory_space<vmem>>, %arg12: memref<16x1xf32, #tpu.memory_space<vmem>>, %arg13: memref<16x1xf32, #tpu.memory_space<vmem>>, %arg14: memref<16x1xi32, #tpu.memory_space<vmem>>) attributes {dimension_semantics = [#tpu.dimension_semantics<parallel>, #tpu.dimension_semantics<parallel>, #tpu.dimension_semantics<arbitrary>], iteration_bounds = array<i64: 1, 1, 1>, scalar_prefetch = 0 : i64, scratch_operands = 5 : i64, tpu.core_type = #tpu.core_type<tc>, window_params = [{transform_indices = @transform_0, window_bounds = array<i64: 16, 256>}, {transform_indices = @transform_1, window_bounds = array<i64: 256, 1024>}, {transform_indices = @transform_2, window_bounds = array<i64: 16, 1>}, {transform_indices = @transform_3, window_bounds = array<i64: 1, 16, 128>}, {transform_indices = @transform_4, window_bounds = array<i64: 1, 16, 128>}, {transform_indices = @transform_5, window_bounds = array<i64: 1, 16, 128>}, {transform_indices = @transform_6, window_bounds = array<i64: 1, 16, 128>}]} {
    %c0_i32 = arith.constant 0 : i32
    %0 = arith.cmpi eq, %arg2, %c0_i32 : i32
    %1 = arith.extui %0 : i1 to i32
    %c0_i32_0 = arith.constant 0 : i32
    %2 = arith.cmpi ne, %1, %c0_i32_0 : i32
    scf.if %2 {
      %c0_42 = arith.constant 0 : index
      %c0_43 = arith.constant 0 : index
      %90 = vector.load %arg3[%c0_42, %c0_43] : memref<16x256xf32, #tpu.memory_space<vmem>>, vector<16x256xf32>
      %91 = arith.mulf %90, %90 : vector<16x256xf32>
      %cst_44 = arith.constant dense<0.000000e+00> : vector<16xf32>
      %92 = vector.multi_reduction <add>, %91, %cst_44 [1] : vector<16x256xf32> to vector<16xf32>
      %93 = vector.shape_cast %92 : vector<16xf32> to vector<16x1xf32>
      %cst_45 = arith.constant 1.000000e-24 : f32
      %94 = vector.broadcast %cst_45 : f32 to vector<16x1xf32>
      %95 = arith.maximumf %93, %94 : vector<16x1xf32>
      %96 = math.rsqrt %95 : vector<16x1xf32>
      %97 = vector.broadcast %96 : vector<16x1xf32> to vector<16x256xf32>
      %98 = arith.mulf %90, %97 : vector<16x256xf32>
      %c0_46 = arith.constant 0 : index
      %c0_47 = arith.constant 0 : index
      %99 = vector.load %arg10[%c0_46, %c0_47] : memref<16x256xf32, #tpu.memory_space<vmem>>, vector<16x256xf32>
      tpu.vector_store %arg10[%c0_46, %c0_47], %98 {strides = array<i32>} : memref<16x256xf32, #tpu.memory_space<vmem>>, vector<16x256xf32>,
      %cst_48 = arith.constant -1.000000e+30 : f32
      %100 = vector.broadcast %cst_48 : f32 to vector<16x1xf32>
      %c0_49 = arith.constant 0 : index
      %c0_50 = arith.constant 0 : index
      %101 = vector.load %arg11[%c0_49, %c0_50] : memref<16x1xf32, #tpu.memory_space<vmem>>, vector<16x1xf32>
      tpu.vector_store %arg11[%c0_49, %c0_50], %100 {strides = array<i32>} : memref<16x1xf32, #tpu.memory_space<vmem>>, vector<16x1xf32>,
      %cst_51 = arith.constant 0.000000e+00 : f32
      %102 = vector.broadcast %cst_51 : f32 to vector<16x1xf32>
      %c0_52 = arith.constant 0 : index
      %c0_53 = arith.constant 0 : index
      %103 = vector.load %arg12[%c0_52, %c0_53] : memref<16x1xf32, #tpu.memory_space<vmem>>, vector<16x1xf32>
      tpu.vector_store %arg12[%c0_52, %c0_53], %102 {strides = array<i32>} : memref<16x1xf32, #tpu.memory_space<vmem>>, vector<16x1xf32>,
      %cst_54 = arith.constant 0.000000e+00 : f32
      %104 = vector.broadcast %cst_54 : f32 to vector<16x1xf32>
      %c0_55 = arith.constant 0 : index
      %c0_56 = arith.constant 0 : index
      %105 = vector.load %arg13[%c0_55, %c0_56] : memref<16x1xf32, #tpu.memory_space<vmem>>, vector<16x1xf32>
      tpu.vector_store %arg13[%c0_55, %c0_56], %104 {strides = array<i32>} : memref<16x1xf32, #tpu.memory_space<vmem>>, vector<16x1xf32>,
      %c0_i32_57 = arith.constant 0 : i32
      %106 = vector.broadcast %c0_i32_57 : i32 to vector<16x1xi32>
      %c0_58 = arith.constant 0 : index
      %c0_59 = arith.constant 0 : index
      %107 = vector.load %arg14[%c0_58, %c0_59] : memref<16x1xi32, #tpu.memory_space<vmem>>, vector<16x1xi32>
      tpu.vector_store %arg14[%c0_58, %c0_59], %106 {strides = array<i32>} : memref<16x1xi32, #tpu.memory_space<vmem>>, vector<16x1xi32>,
    } else {
    }
    %c0 = arith.constant 0 : index
    %c0_1 = arith.constant 0 : index
    %3 = vector.load %arg10[%c0, %c0_1] : memref<16x256xf32, #tpu.memory_space<vmem>>, vector<16x256xf32>
    %c0_2 = arith.constant 0 : index
    %c0_3 = arith.constant 0 : index
    %4 = vector.load %arg4[%c0_2, %c0_3] : memref<256x1024xf32, #tpu.memory_space<vmem>>, vector<256x1024xf32>
    %cst = arith.constant dense<0.000000e+00> : vector<16x1024xf32>
    %5 = tpu.matmul %3, %4, %cst {dimension_numbers = #tpu.dot_dimension_numbers<[1], [0], [0], [1], [0, 0, 1, 1], [], []>} : vector<16x256xf32>, vector<256x1024xf32>, vector<16x1024xf32> -> vector<16x1024xf32>
    %c0_4 = arith.constant 0 : index
    %c0_5 = arith.constant 0 : index
    %6 = vector.load %arg5[%c0_4, %c0_5] : memref<16x1xi32, #tpu.memory_space<vmem>>, vector<16x1xi32>
    %c1_i32 = arith.constant 1 : i32
    %7 = arith.muli %arg0, %c1_i32 : i32
    %8 = arith.addi %7, %arg2 : i32
    %c1024_i32 = arith.constant 1024 : i32
    %9 = arith.muli %8, %c1024_i32 : i32
    %10 = tpu.iota {dimensions = array<i32: 1>} : vector<16x1024xi32>
    %11 = vector.broadcast %9 : i32 to vector<16x1024xi32>
    %12 = arith.addi %11, %10 : vector<16x1024xi32>
    %13 = vector.broadcast %6 : vector<16x1xi32> to vector<16x1024xi32>
    %14 = arith.cmpi eq, %12, %13 : vector<16x1024xi32>
    %cst_6 = arith.constant 0.000000e+00 : f32
    %15 = vector.broadcast %cst_6 : f32 to vector<16x1024xf32>
    %16 = arith.select %14, %5, %15 : vector<16x1024xi1>, vector<16x1024xf32>
    %cst_7 = arith.constant dense<0.000000e+00> : vector<16xf32>
    %17 = vector.multi_reduction <add>, %16, %cst_7 [1] : vector<16x1024xf32> to vector<16xf32>
    %18 = vector.shape_cast %17 : vector<16xf32> to vector<16x1xf32>
    %19 = vector.broadcast %9 : i32 to vector<16x1xi32>
    %20 = arith.cmpi sge, %6, %19 : vector<16x1xi32>
    %c1024_i32_8 = arith.constant 1024 : i32
    %21 = arith.addi %9, %c1024_i32_8 : i32
    %22 = vector.broadcast %21 : i32 to vector<16x1xi32>
    %23 = arith.cmpi slt, %6, %22 : vector<16x1xi32>
    %24 = arith.andi %20, %23 : vector<16x1xi1>
    %25 = arith.mulf %18, %18 : vector<16x1xf32>
    %cst_9 = arith.constant 1.000000e+00 : f32
    %26 = vector.broadcast %cst_9 : f32 to vector<16x1xf32>
    %27 = arith.subf %26, %25 : vector<16x1xf32>
    %cst_10 = arith.constant 0.000000e+00 : f32
    %cst_11 = arith.constant 1.000000e+00 : f32
    %28 = vector.broadcast %cst_10 : f32 to vector<16x1xf32>
    %29 = arith.maximumf %28, %27 : vector<16x1xf32>
    %30 = vector.broadcast %cst_11 : f32 to vector<16x1xf32>
    %31 = arith.minimumf %30, %29 : vector<16x1xf32>
    %32 = math.sqrt %31 : vector<16x1xf32>
    %cst_12 = arith.constant 0.980066597 : f32
    %33 = vector.broadcast %cst_12 : f32 to vector<16x1xf32>
    %34 = arith.mulf %18, %33 : vector<16x1xf32>
    %cst_13 = arith.constant 0.198669329 : f32
    %35 = vector.broadcast %cst_13 : f32 to vector<16x1xf32>
    %36 = arith.mulf %32, %35 : vector<16x1xf32>
    %37 = arith.subf %34, %36 : vector<16x1xf32>
    %cst_14 = arith.constant -0.980066597 : f32
    %38 = vector.broadcast %cst_14 : f32 to vector<16x1xf32>
    %39 = arith.subf %18, %38 : vector<16x1xf32>
    %cst_15 = arith.constant 0.000000e+00 : f32
    %40 = vector.broadcast %cst_15 : f32 to vector<16x1xf32>
    %41 = arith.cmpf ogt, %39, %40 : vector<16x1xf32>
    %cst_16 = arith.constant 0.0397338644 : f32
    %42 = vector.broadcast %cst_16 : f32 to vector<16x1xf32>
    %43 = arith.subf %18, %42 : vector<16x1xf32>
    %44 = arith.select %41, %37, %43 : vector<16x1xi1>, vector<16x1xf32>
    %cst_17 = arith.constant 3.000000e+01 : f32
    %45 = vector.broadcast %cst_17 : f32 to vector<16x1xf32>
    %46 = arith.mulf %45, %44 : vector<16x1xf32>
    %c1000_i32 = arith.constant 1000 : i32
    %47 = vector.broadcast %c1000_i32 : i32 to vector<16x1024xi32>
    %48 = arith.cmpi slt, %12, %47 : vector<16x1024xi32>
    %cst_18 = arith.constant 3.000000e+01 : f32
    %49 = vector.broadcast %cst_18 : f32 to vector<16x1024xf32>
    %50 = arith.mulf %49, %5 : vector<16x1024xf32>
    %cst_19 = arith.constant -1.000000e+30 : f32
    %51 = vector.broadcast %cst_19 : f32 to vector<16x1024xf32>
    %52 = arith.select %48, %50, %51 : vector<16x1024xi1>, vector<16x1024xf32>
    %53 = vector.shape_cast %46 : vector<16x1xf32> to vector<16x1xf32>
    %54 = vector.broadcast %53 : vector<16x1xf32> to vector<16x1024xf32>
    %55 = arith.select %14, %54, %52 : vector<16x1024xi1>, vector<16x1024xf32>
    %c0_20 = arith.constant 0 : index
    %c0_21 = arith.constant 0 : index
    %56 = vector.load %arg11[%c0_20, %c0_21] : memref<16x1xf32, #tpu.memory_space<vmem>>, vector<16x1xf32>
    %cst_22 = arith.constant dense<0xFF800000> : vector<16xf32>
    %57 = vector.multi_reduction <maximumf>, %55, %cst_22 [1] : vector<16x1024xf32> to vector<16xf32>
    %58 = vector.shape_cast %57 : vector<16xf32> to vector<16x1xf32>
    %59 = arith.maximumf %56, %58 : vector<16x1xf32>
    %60 = arith.subf %56, %59 : vector<16x1xf32>
    %61 = math.exp %60 : vector<16x1xf32>
    %c0_23 = arith.constant 0 : index
    %c0_24 = arith.constant 0 : index
    %62 = vector.load %arg12[%c0_23, %c0_24] : memref<16x1xf32, #tpu.memory_space<vmem>>, vector<16x1xf32>
    %63 = arith.mulf %62, %61 : vector<16x1xf32>
    %64 = vector.broadcast %59 : vector<16x1xf32> to vector<16x1024xf32>
    %65 = arith.subf %55, %64 : vector<16x1024xf32>
    %66 = math.exp %65 : vector<16x1024xf32>
    %cst_25 = arith.constant dense<0.000000e+00> : vector<16xf32>
    %67 = vector.multi_reduction <add>, %66, %cst_25 [1] : vector<16x1024xf32> to vector<16xf32>
    %68 = vector.shape_cast %67 : vector<16xf32> to vector<16x1xf32>
    %69 = arith.addf %63, %68 : vector<16x1xf32>
    %c0_26 = arith.constant 0 : index
    %c0_27 = arith.constant 0 : index
    %70 = vector.load %arg12[%c0_26, %c0_27] : memref<16x1xf32, #tpu.memory_space<vmem>>, vector<16x1xf32>
    tpu.vector_store %arg12[%c0_26, %c0_27], %69 {strides = array<i32>} : memref<16x1xf32, #tpu.memory_space<vmem>>, vector<16x1xf32>,
    %c0_28 = arith.constant 0 : index
    %c0_29 = arith.constant 0 : index
    %71 = vector.load %arg11[%c0_28, %c0_29] : memref<16x1xf32, #tpu.memory_space<vmem>>, vector<16x1xf32>
    tpu.vector_store %arg11[%c0_28, %c0_29], %59 {strides = array<i32>} : memref<16x1xf32, #tpu.memory_space<vmem>>, vector<16x1xf32>,
    %c0_30 = arith.constant 0 : index
    %c0_31 = arith.constant 0 : index
    %72 = vector.load %arg13[%c0_30, %c0_31] : memref<16x1xf32, #tpu.memory_space<vmem>>, vector<16x1xf32>
    %cst_32 = arith.constant 0.000000e+00 : f32
    %73 = vector.broadcast %cst_32 : f32 to vector<16x1xf32>
    %74 = arith.select %24, %46, %73 : vector<16x1xi1>, vector<16x1xf32>
    %75 = arith.addf %72, %74 : vector<16x1xf32>
    %c0_33 = arith.constant 0 : index
    %c0_34 = arith.constant 0 : index
    %76 = vector.load %arg13[%c0_33, %c0_34] : memref<16x1xf32, #tpu.memory_space<vmem>>, vector<16x1xf32>
    tpu.vector_store %arg13[%c0_33, %c0_34], %75 {strides = array<i32>} : memref<16x1xf32, #tpu.memory_space<vmem>>, vector<16x1xf32>,
    %77 = vector.broadcast %58 : vector<16x1xf32> to vector<16x1024xf32>
    %78 = arith.cmpf oge, %55, %77 : vector<16x1024xf32>
    %c1073741824_i32 = arith.constant 1073741824 : i32
    %79 = vector.broadcast %c1073741824_i32 : i32 to vector<16x1024xi32>
    %80 = arith.select %78, %12, %79 : vector<16x1024xi1>, vector<16x1024xi32>
    %cst_35 = arith.constant dense<2147483647> : vector<16xi32>
    %81 = vector.multi_reduction <minsi>, %80, %cst_35 [1] : vector<16x1024xi32> to vector<16xi32>
    %82 = vector.shape_cast %81 : vector<16xi32> to vector<16x1xi32>
    %83 = arith.cmpf ogt, %58, %56 : vector<16x1xf32>
    %c0_36 = arith.constant 0 : index
    %c0_37 = arith.constant 0 : index
    %84 = vector.load %arg14[%c0_36, %c0_37] : memref<16x1xi32, #tpu.memory_space<vmem>>, vector<16x1xi32>
    %85 = arith.select %83, %82, %84 : vector<16x1xi1>, vector<16x1xi32>
    %c0_38 = arith.constant 0 : index
    %c0_39 = arith.constant 0 : index
    %86 = vector.load %arg14[%c0_38, %c0_39] : memref<16x1xi32, #tpu.memory_space<vmem>>, vector<16x1xi32>
    tpu.vector_store %arg14[%c0_38, %c0_39], %85 {strides = array<i32>} : memref<16x1xi32, #tpu.memory_space<vmem>>, vector<16x1xi32>,
    %c0_i32_40 = arith.constant 0 : i32
    %87 = arith.cmpi eq, %arg2, %c0_i32_40 : i32
    %88 = arith.extui %87 : i1 to i32
    %c0_i32_41 = arith.constant 0 : i32
    %89 = arith.cmpi ne, %88, %c0_i32_41 : i32
    scf.if %89 {
      %c0_42 = arith.constant 0 : index
      %c0_43 = arith.constant 0 : index
      %90 = vector.load %arg11[%c0_42, %c0_43] : memref<16x1xf32, #tpu.memory_space<vmem>>, vector<16x1xf32>
      %91 = vector.shape_cast %90 : vector<16x1xf32> to vector<1x16x1xf32>
      %92 = vector.shape_cast %91 : vector<1x16x1xf32> to vector<1x16x1xf32>
      %93 = vector.broadcast %92 : vector<1x16x1xf32> to vector<1x16x128xf32>
      %c0_44 = arith.constant 0 : index
      %c0_45 = arith.constant 0 : index
      %c0_46 = arith.constant 0 : index
      %94 = vector.load %arg6[%c0_44, %c0_45, %c0_46] : memref<1x16x128xf32, #tpu.memory_space<vmem>>, vector<1x16x128xf32>
      tpu.vector_store %arg6[%c0_44, %c0_45, %c0_46], %93 {strides = array<i32>} : memref<1x16x128xf32, #tpu.memory_space<vmem>>, vector<1x16x128xf32>,
      %c0_47 = arith.constant 0 : index
      %c0_48 = arith.constant 0 : index
      %95 = vector.load %arg12[%c0_47, %c0_48] : memref<16x1xf32, #tpu.memory_space<vmem>>, vector<16x1xf32>
      %96 = vector.shape_cast %95 : vector<16x1xf32> to vector<1x16x1xf32>
      %97 = vector.shape_cast %96 : vector<1x16x1xf32> to vector<1x16x1xf32>
      %98 = vector.broadcast %97 : vector<1x16x1xf32> to vector<1x16x128xf32>
      %c0_49 = arith.constant 0 : index
      %c0_50 = arith.constant 0 : index
      %c0_51 = arith.constant 0 : index
      %99 = vector.load %arg7[%c0_49, %c0_50, %c0_51] : memref<1x16x128xf32, #tpu.memory_space<vmem>>, vector<1x16x128xf32>
      tpu.vector_store %arg7[%c0_49, %c0_50, %c0_51], %98 {strides = array<i32>} : memref<1x16x128xf32, #tpu.memory_space<vmem>>, vector<1x16x128xf32>,
      %c0_52 = arith.constant 0 : index
      %c0_53 = arith.constant 0 : index
      %100 = vector.load %arg13[%c0_52, %c0_53] : memref<16x1xf32, #tpu.memory_space<vmem>>, vector<16x1xf32>
      %101 = vector.shape_cast %100 : vector<16x1xf32> to vector<1x16x1xf32>
      %102 = vector.shape_cast %101 : vector<1x16x1xf32> to vector<1x16x1xf32>
      %103 = vector.broadcast %102 : vector<1x16x1xf32> to vector<1x16x128xf32>
      %c0_54 = arith.constant 0 : index
      %c0_55 = arith.constant 0 : index
      %c0_56 = arith.constant 0 : index
      %104 = vector.load %arg8[%c0_54, %c0_55, %c0_56] : memref<1x16x128xf32, #tpu.memory_space<vmem>>, vector<1x16x128xf32>
      tpu.vector_store %arg8[%c0_54, %c0_55, %c0_56], %103 {strides = array<i32>} : memref<1x16x128xf32, #tpu.memory_space<vmem>>, vector<1x16x128xf32>,
      %c0_57 = arith.constant 0 : index
      %c0_58 = arith.constant 0 : index
      %105 = vector.load %arg14[%c0_57, %c0_58] : memref<16x1xi32, #tpu.memory_space<vmem>>, vector<16x1xi32>
      %106 = vector.shape_cast %105 : vector<16x1xi32> to vector<1x16x1xi32>
      %107 = vector.shape_cast %106 : vector<1x16x1xi32> to vector<1x16x1xi32>
      %108 = vector.broadcast %107 : vector<1x16x1xi32> to vector<1x16x128xi32>
      %c0_59 = arith.constant 0 : index
      %c0_60 = arith.constant 0 : index
      %c0_61 = arith.constant 0 : index
      %109 = vector.load %arg9[%c0_59, %c0_60, %c0_61] : memref<1x16x128xi32, #tpu.memory_space<vmem>>, vector<1x16x128xi32>
      tpu.vector_store %arg9[%c0_59, %c0_60, %c0_61], %108 {strides = array<i32>} : memref<1x16x128xi32, #tpu.memory_space<vmem>>, vector<1x16x128xi32>,
    } else {
    }
    return
  }
  func.func @transform_0(%arg0: i32, %arg1: i32, %arg2: i32) -> (i32, i32) {
    %c0_i32 = arith.constant 0 : i32
    %c0_i32_0 = arith.constant 0 : i32
    return %arg1, %c0_i32 : i32, i32
  }
  func.func @transform_1(%arg0: i32, %arg1: i32, %arg2: i32) -> (i32, i32) {
    %c1_i32 = arith.constant 1 : i32
    %0 = arith.muli %arg0, %c1_i32 : i32
    %1 = arith.addi %0, %arg2 : i32
    %c0_i32 = arith.constant 0 : i32
    %c0_i32_0 = arith.constant 0 : i32
    return %c0_i32, %1 : i32, i32
  }
  func.func @transform_2(%arg0: i32, %arg1: i32, %arg2: i32) -> (i32, i32) {
    %c0_i32 = arith.constant 0 : i32
    %c0_i32_0 = arith.constant 0 : i32
    return %arg1, %c0_i32 : i32, i32
  }
  func.func @transform_3(%arg0: i32, %arg1: i32, %arg2: i32) -> (i32, i32, i32) {
    %c0_i32 = arith.constant 0 : i32
    %c0_i32_0 = arith.constant 0 : i32
    return %arg0, %arg1, %c0_i32 : i32, i32, i32
  }
  func.func @transform_4(%arg0: i32, %arg1: i32, %arg2: i32) -> (i32, i32, i32) {
    %c0_i32 = arith.constant 0 : i32
    %c0_i32_0 = arith.constant 0 : i32
    return %arg0, %arg1, %c0_i32 : i32, i32, i32
  }
  func.func @transform_5(%arg0: i32, %arg1: i32, %arg2: i32) -> (i32, i32, i32) {
    %c0_i32 = arith.constant 0 : i32
    %c0_i32_0 = arith.constant 0 : i32
    return %arg0, %arg1, %c0_i32 : i32, i32, i32
  }
  func.func @transform_6(%arg0: i32, %arg1: i32, %arg2: i32) -> (i32, i32, i32) {
    %c0_i32 = arith.constant 0 : i32
    %c0_i32_0 = arith.constant 0 : i32
    return %arg0, %arg1, %c0_i32 : i32, i32, i32
  }
}

</mosaic_0001>

<bundles_post_ra>
// kernel: tpu_custom_call.1
= control target key start
LH: loop header
LB: loop body
LE: loop exit
PB: predicated region body
PF: predicated region fallthrough
CT: control target
= control target key end

     0   :  { %12 = vsyncpa [#allocation8], 0  ;;  %s2271_s0 = inlined_call_operand.hbm [shape: f32[16,256], index: 0, kind: input, shape index: {}]   ;;  %s2272_s1 = inlined_call_operand.hbm [shape: f32[256,1024], index: 1, kind: input, shape index: {}]   ;;  %s2273_s2 = inlined_call_operand.vmem [shape: s32[16,1], index: 2, kind: input, shape index: {}]   ;;  %s2274_s3 = inlined_call_operand.hbm [shape: f32[1,16,128], index: 3, kind: output, shape index: {0}]   ;;  %s2275_s4 = inlined_call_operand.hbm [shape: f32[1,16,128], index: 4, kind: output, shape index: {1}]   ;;  %s2276_s5 = inlined_call_operand.hbm [shape: f32[1,16,128], index: 5, kind: output, shape index: {2}]   ;;  %s2277_s6 = inlined_call_operand.hbm [shape: s32[1,16,128], index: 6, kind: output, shape index: {3}]  }
   0x1   :  { %13 = vsyncpa [#allocation11], 0 }
   0x2   :  { %14 = vsyncpa [#allocation9], 0 }
   0x3   :  { %15 = vsyncpa [#allocation14], 0 }
   0x4   :  { %16 = vsyncpa [#allocation17], 0  ;;  %s1644_s21 = smov [#allocation7]   ;;  %s1502_s25 = scalar_lea.hbm %s2271_s0, 512 }
   0x5   :  { %s22_s22 = sshll.u32 %s1644_s21, 4  ;;  %p1503_p0 = scmp.ne.s32.totalorder %s2271_s0, %s1502_s25  ;;  %s23_s22 = int_to_ptr.vmem [resolvable:$true] %s22_s22 }
   0x6   :  { %p1506_p1 = scmp.lt.u32.totalorder %s1502_s25, %s2271_s0 }
   0x8   :  { %p1508_p2 = pnand %p1506_p1, %p1503_p0 }
   0xa   :  { %1511 = shalt.err (!%p1508_p2)
}
   0xb   :  { %s1512_s30 = scalar_lea.vmem %s23_s22, 512  ;;  %p1517_p4 = scmp.lt.s32.totalorder %s23_s22, %s23_s22 }
   0xc   :  { %p1513_p3 = scmp.ne.s32.totalorder %s23_s22, %s1512_s30  ;;  %p1518_p5 = scmp.lt.s32.totalorder %s1512_s30, %s1512_s30 }
   0xe   :  { %p1519_p6 = por %p1518_p5, %p1517_p4 }
  0x10   :  { %p1520_p7 = pnand %p1519_p6, %p1513_p3 }
  0x12   :  { %1523 = shalt.err (!%p1520_p7)
}
  0x13   :  { %s1645_s7 = smov 256   ;;  %s1646_s8 = smov 16  }
  0x14   :  { %28 = dma.hbm_to_vmem [thread:$0]  %s2271_s0, 512, %s23_s22, [#allocation8], %s1645_s7, %s1645_s7, %s1646_s8  }
  0x15   :  { %s1647_s11 = smov [#allocation10]   ;;  %s1524_s15 = scalar_lea.hbm %s2272_s1, 32768 }
  0x16   :  { %s38_s12 = sshll.u32 %s1647_s11, 4  ;;  %p1525_p8 = scmp.ne.s32.totalorder %s2272_s1, %s1524_s15  ;;  %s39_s12 = int_to_ptr.vmem [resolvable:$true] %s38_s12 }
  0x17   :  { %p1528_p9 = scmp.lt.u32.totalorder %s1524_s15, %s2272_s1 }
  0x19   :  { %p1530_p10 = pnand %p1528_p9, %p1525_p8 }
  0x1b   :  { %1533 = shalt.err (!%p1530_p10)
}
  0x1c   :  { %s1534_s20 = scalar_lea.vmem %s39_s12, 32768  ;;  %p1539_p12 = scmp.lt.s32.totalorder %s39_s12, %s39_s12 }
  0x1d   :  { %p1535_p11 = scmp.ne.s32.totalorder %s39_s12, %s1534_s20  ;;  %p1540_p13 = scmp.lt.s32.totalorder %s1534_s20, %s1534_s20 }
  0x1f   :  { %p1541_p0 = por %p1540_p13, %p1539_p12 }
  0x21   :  { %p1542_p1 = pnand %p1541_p0, %p1535_p11 }
  0x23   :  { %1545 = shalt.err (!%p1542_p1)
}
  0x24   :  { %s1648_s0 = smov 1024   ;;  %s1649_s21 = smov 64  }
  0x25   :  { %44 = dma.hbm_to_vmem [thread:$0]  %s2272_s1, 32768, %s39_s12, [#allocation11], %s1648_s0, %s1648_s0, %s1649_s21  }
  0x26   :  { %1634 = dma.done.wait [#allocation8], 512  }
  0x27   :  { %1635 = vsyncadd [#allocation8], 4294966784 }
  0x28   :  { %1636 = dma.done.wait [#allocation11], 32768  }
  0x29   :  { %1637 = vsyncadd [#allocation11], 4294934528  ;;  %v1718_v0 = vld [vmem:[#allocation7] sm:$0xff]  ;;  %v1720_v1 = vld [vmem:[#allocation7 + $0x8] sm:$0xff]  ;;  %vm2279_vm0 = vcmask 7168  }
  0x2a   :  { %v1722_v2 = vld [vmem:[#allocation7 + $0x10] sm:$0xff]  ;;  %v63_v3 = vmul.f32 %v1718_v0, %v1718_v0  ;;  %v64_v4 = vmul.f32 %v1720_v1, %v1720_v1  ;;  %v1728_v5 = vld [vmem:[#allocation7 + $0x18] sm:$0xff]  ;;  %v99_v7 = vld [vmem:[#allocation10 + $0x8] sm:$0xff] }
  0x2b   :  { %v65_v6 = vmul.f32 %v1722_v2, %v1722_v2  ;;  %v107_v8 = vld [vmem:[#allocation10 + $0x48] sm:$0xff]  ;;  %v66_v9 = vmul.f32 %v1728_v5, %v1728_v5  ;;  %v101_v11 = vld [vmem:[#allocation10 + $0x18] sm:$0xff]  ;;  %v98_v13 = vld [vmem:[#allocation10] sm:$0xff] }
  0x2c   :  { %v1185_v10 = vpack.c.bf16 %v107_v8, %v99_v7  ;;  %v109_v12 = vld [vmem:[#allocation10 + $0x58] sm:$0xff]  ;;  %v67_v14 = vadd.f32 %v64_v4, %v63_v3  ;;  %v106_v16 = vld [vmem:[#allocation10 + $0x40] sm:$0xff]  ;;  %v100_v17 = vld [vmem:[#allocation10 + $0x10] sm:$0xff] }
  0x2d   :  { %v1249_v15 = vpack.c.bf16 %v109_v12, %v101_v11  ;;  %v108_v18 = vld [vmem:[#allocation10 + $0x50] sm:$0xff]  ;;  %v1187_v19 = vpack.c.bf16 %v106_v16, %v98_v13  ;;  %v115_v21 = vld [vmem:[#allocation10 + $0x88] sm:$0xff]  ;;  %v117_v23 = vld [vmem:[#allocation10 + $0x98] sm:$0xff]  ;;  %v70_v24 = vadd.f32 %v66_v9, %v65_v6 }
  0x2e   :  { %1186 = vmatprep.subr.bf16.mxu0 %v1185_v10  ;;  %v1251_v20 = vpack.c.bf16 %v108_v18, %v100_v17  ;;  %v123_v22 = vld [vmem:[#allocation10 + $0xc8] sm:$0xff]  ;;  %68 = vadd.xlane.f32.xlu0 %v67_v14  ;;  %v125_v26 = vld [vmem:[#allocation10 + $0xd8] sm:$0xff]  ;;  %v114_v27 = vld [vmem:[#allocation10 + $0x80] sm:$0xff] }
  0x2f   :  { %1250 = vmatprep.subr.bf16.mxu1 %v1249_v15  ;;  %v1189_v25 = vpack.c.bf16 %v123_v22, %v115_v21  ;;  %v122_v28 = vld [vmem:[#allocation10 + $0xc0] sm:$0xff]  ;;  %1188 = vmatpush1.bf16.msra.mxu0 %v1187_v19  ;;  %v1253_v29 = vpack.c.bf16 %v125_v26, %v117_v23  ;;  %v116_v31 = vld [vmem:[#allocation10 + $0x90] sm:$0xff]  ;;  %v131_v33 = vld [vmem:[#allocation10 + $0x108] sm:$0xff] }
  0x30   :  { %1252 = vmatpush1.bf16.msra.mxu1 %v1251_v20  ;;  %v1191_v30 = vpack.c.bf16 %v122_v28, %v114_v27  ;;  %v124_v32 = vld [vmem:[#allocation10 + $0xd0] sm:$0xff]  ;;  %v139_v35 = vld [vmem:[#allocation10 + $0x148] sm:$0xff]  ;;  %v133_v36 = vld [vmem:[#allocation10 + $0x118] sm:$0xff] }
  0x31   :  { %1190 = vmatprep.subr.bf16.mxu0 %v1189_v25  ;;  %v1255_v34 = vpack.c.bf16 %v124_v32, %v116_v31  ;;  %v141_v37 = vld [vmem:[#allocation10 + $0x158] sm:$0xff]  ;;  %1254 = vmatprep.subr.bf16.mxu1 %v1253_v29  ;;  %v1193_v38 = vpack.c.bf16 %v139_v35, %v131_v33  ;;  %v130_v40 = vld [vmem:[#allocation10 + $0x100] sm:$0xff]  ;;  %v132_v42 = vld [vmem:[#allocation10 + $0x110] sm:$0xff] }
  0x32   :  { %v1257_v39 = vpack.c.bf16 %v141_v37, %v133_v36  ;;  %v138_v41 = vld [vmem:[#allocation10 + $0x140] sm:$0xff]  ;;  %71 = vadd.xlane.f32.xlu0 %v70_v24  ;;  %v140_v43 = vld [vmem:[#allocation10 + $0x150] sm:$0xff]  ;;  %v147_v44 = vld [vmem:[#allocation10 + $0x188] sm:$0xff] }
  0x33   :  { %v155_v45 = vld [vmem:[#allocation10 + $0x1c8] sm:$0xff]  ;;  %1192 = vmatpush1.bf16.msra.mxu0 %v1191_v30  ;;  %v1195_v46 = vpack.c.bf16 %v138_v41, %v130_v40  ;;  %v1259_v47 = vpack.c.bf16 %v140_v43, %v132_v42  ;;  %v149_v48 = vld [vmem:[#allocation10 + $0x198] sm:$0xff]  ;;  %v146_v50 = vld [vmem:[#allocation10 + $0x180] sm:$0xff] }
  0x34   :  { %1256 = vmatpush1.bf16.msra.mxu1 %v1255_v34  ;;  %v157_v49 = vld [vmem:[#allocation10 + $0x1d8] sm:$0xff]  ;;  %1194 = vmatprep.subr.bf16.mxu0 %v1193_v38  ;;  %v1197_v51 = vpack.c.bf16 %v155_v45, %v147_v44  ;;  %v154_v53 = vld [vmem:[#allocation10 + $0x1c0] sm:$0xff]  ;;  %v148_v54 = vld [vmem:[#allocation10 + $0x190] sm:$0xff] }
  0x35   :  { %1258 = vmatprep.subr.bf16.mxu1 %v1257_v39  ;;  %v1261_v52 = vpack.c.bf16 %v157_v49, %v149_v48  ;;  %v156_v55 = vld [vmem:[#allocation10 + $0x1d0] sm:$0xff]  ;;  %v163_v56 = vld [vmem:[#allocation10 + $0x208] sm:$0xff]  ;;  %v165_v58 = vld [vmem:[#allocation10 + $0x218] sm:$0xff]  ;;  %v1199_v60 = vpack.c.bf16 %v154_v53, %v146_v50 }
  0x36   :  { %v171_v57 = vld [vmem:[#allocation10 + $0x248] sm:$0xff]  ;;  %v173_v59 = vld [vmem:[#allocation10 + $0x258] sm:$0xff]  ;;  %v1263_v61 = vpack.c.bf16 %v156_v55, %v148_v54  ;;  %v162_v62 = vld [vmem:[#allocation10 + $0x200] sm:$0xff] }
  0x37   :  { %1196 = vmatpush1.bf16.msra.mxu0 %v1195_v46  ;;  %v170_v63 = vld [vmem:[#allocation10 + $0x240] sm:$0xff]  ;;  %v1201_v3 = vpack.c.bf16 %v171_v57, %v163_v56  ;;  %v1265_v4 = vpack.c.bf16 %v173_v59, %v165_v58  ;;  %v164_v6 = vld [vmem:[#allocation10 + $0x210] sm:$0xff]  ;;  %v179_v8 = vld [vmem:[#allocation10 + $0x288] sm:$0xff] }
  0x38   :  { %1260 = vmatpush1.bf16.msra.mxu1 %v1259_v47  ;;  %1198 = vmatprep.subr.bf16.mxu0 %v1197_v51  ;;  %v172_v7 = vld [vmem:[#allocation10 + $0x250] sm:$0xff]  ;;  %v187_v9 = vld [vmem:[#allocation10 + $0x2c8] sm:$0xff]  ;;  %v181_v10 = vld [vmem:[#allocation10 + $0x298] sm:$0xff]  ;;  %v1203_v12 = vpack.c.bf16 %v170_v63, %v162_v62 }
  0x39   :  { %1262 = vmatprep.subr.bf16.mxu1 %v1261_v52  ;;  %v189_v11 = vld [vmem:[#allocation10 + $0x2d8] sm:$0xff]  ;;  %v1267_v13 = vpack.c.bf16 %v172_v7, %v164_v6  ;;  %v178_v14 = vld [vmem:[#allocation10 + $0x280] sm:$0xff]  ;;  %v1205_v16 = vpack.c.bf16 %v187_v9, %v179_v8  ;;  %v180_v18 = vld [vmem:[#allocation10 + $0x290] sm:$0xff] }
  0x3a   :  { %v186_v15 = vld [vmem:[#allocation10 + $0x2c0] sm:$0xff]  ;;  %v1269_v17 = vpack.c.bf16 %v189_v11, %v181_v10  ;;  %v188_v19 = vld [vmem:[#allocation10 + $0x2d0] sm:$0xff]  ;;  %v195_v20 = vld [vmem:[#allocation10 + $0x308] sm:$0xff] }
  0x3b   :  { %1200 = vmatpush1.bf16.msra.mxu0 %v1199_v60  ;;  %v203_v21 = vld [vmem:[#allocation10 + $0x348] sm:$0xff]  ;;  %v197_v22 = vld [vmem:[#allocation10 + $0x318] sm:$0xff]  ;;  %v1207_v24 = vpack.c.bf16 %v186_v15, %v178_v14  ;;  %v1271_v25 = vpack.c.bf16 %v188_v19, %v180_v18  ;;  %v194_v26 = vld [vmem:[#allocation10 + $0x300] sm:$0xff] }
  0x3c   :  { %1264 = vmatpush1.bf16.msra.mxu1 %v1263_v61  ;;  %1202 = vmatprep.subr.bf16.mxu0 %v1201_v3  ;;  %v205_v23 = vld [vmem:[#allocation10 + $0x358] sm:$0xff]  ;;  %v202_v27 = vld [vmem:[#allocation10 + $0x340] sm:$0xff]  ;;  %v1209_v28 = vpack.c.bf16 %v203_v21, %v195_v20  ;;  %v196_v30 = vld [vmem:[#allocation10 + $0x310] sm:$0xff] }
  0x3d   :  { %1266 = vmatprep.subr.bf16.mxu1 %v1265_v4  ;;  %v1273_v29 = vpack.c.bf16 %v205_v23, %v197_v22  ;;  %v204_v31 = vld [vmem:[#allocation10 + $0x350] sm:$0xff]  ;;  %v211_v32 = vld [vmem:[#allocation10 + $0x388] sm:$0xff]  ;;  %v213_v34 = vld [vmem:[#allocation10 + $0x398] sm:$0xff]  ;;  %v1211_v36 = vpack.c.bf16 %v202_v27, %v194_v26 }
  0x3e   :  { %v219_v33 = vld [vmem:[#allocation10 + $0x3c8] sm:$0xff]  ;;  %v221_v35 = vld [vmem:[#allocation10 + $0x3d8] sm:$0xff]  ;;  %v1275_v37 = vpack.c.bf16 %v204_v31, %v196_v30  ;;  %v210_v38 = vld [vmem:[#allocation10 + $0x380] sm:$0xff] }
  0x3f   :  { %1204 = vmatpush1.bf16.msra.mxu0 %v1203_v12  ;;  %v218_v39 = vld [vmem:[#allocation10 + $0x3c0] sm:$0xff]  ;;  %v1213_v40 = vpack.c.bf16 %v219_v33, %v211_v32  ;;  %v1277_v41 = vpack.c.bf16 %v221_v35, %v213_v34  ;;  %v212_v42 = vld [vmem:[#allocation10 + $0x390] sm:$0xff]  ;;  %v227_v44 = vld [vmem:[#allocation10 + $0x408] sm:$0xff] }
  0x40   :  { %1268 = vmatpush1.bf16.msra.mxu1 %v1267_v13  ;;  %1206 = vmatprep.subr.bf16.mxu0 %v1205_v16  ;;  %v220_v43 = vld [vmem:[#allocation10 + $0x3d0] sm:$0xff]  ;;  %v235_v45 = vld [vmem:[#allocation10 + $0x448] sm:$0xff]  ;;  %v229_v46 = vld [vmem:[#allocation10 + $0x418] sm:$0xff]  ;;  %v1215_v48 = vpack.c.bf16 %v218_v39, %v210_v38 }
  0x41   :  { %1270 = vmatprep.subr.bf16.mxu1 %v1269_v17  ;;  %v237_v47 = vld [vmem:[#allocation10 + $0x458] sm:$0xff]  ;;  %v1279_v49 = vpack.c.bf16 %v220_v43, %v212_v42  ;;  %v226_v50 = vld [vmem:[#allocation10 + $0x400] sm:$0xff]  ;;  %v1217_v52 = vpack.c.bf16 %v235_v45, %v227_v44  ;;  %v228_v54 = vld [vmem:[#allocation10 + $0x410] sm:$0xff] }
  0x42   :  { %v234_v51 = vld [vmem:[#allocation10 + $0x440] sm:$0xff]  ;;  %v1281_v53 = vpack.c.bf16 %v237_v47, %v229_v46  ;;  %v236_v55 = vld [vmem:[#allocation10 + $0x450] sm:$0xff]  ;;  %v243_v56 = vld [vmem:[#allocation10 + $0x488] sm:$0xff] }
  0x43   :  { %1208 = vmatpush1.bf16.msra.mxu0 %v1207_v24  ;;  %v251_v57 = vld [vmem:[#allocation10 + $0x4c8] sm:$0xff]  ;;  %v245_v58 = vld [vmem:[#allocation10 + $0x498] sm:$0xff]  ;;  %v1219_v60 = vpack.c.bf16 %v234_v51, %v226_v50  ;;  %v1283_v61 = vpack.c.bf16 %v236_v55, %v228_v54  ;;  %v242_v62 = vld [vmem:[#allocation10 + $0x480] sm:$0xff] }
  0x44   :  { %1272 = vmatpush1.bf16.msra.mxu1 %v1271_v25  ;;  %1210 = vmatprep.subr.bf16.mxu0 %v1209_v28  ;;  %v253_v59 = vld [vmem:[#allocation10 + $0x4d8] sm:$0xff]  ;;  %v250_v63 = vld [vmem:[#allocation10 + $0x4c0] sm:$0xff]  ;;  %v1221_v3 = vpack.c.bf16 %v251_v57, %v243_v56  ;;  %v244_v6 = vld [vmem:[#allocation10 + $0x490] sm:$0xff] }
  0x45   :  { %1274 = vmatprep.subr.bf16.mxu1 %v1273_v29  ;;  %v1285_v4 = vpack.c.bf16 %v253_v59, %v245_v58  ;;  %v252_v7 = vld [vmem:[#allocation10 + $0x4d0] sm:$0xff]  ;;  %v259_v8 = vld [vmem:[#allocation10 + $0x508] sm:$0xff]  ;;  %v261_v10 = vld [vmem:[#allocation10 + $0x518] sm:$0xff]  ;;  %v1223_v12 = vpack.c.bf16 %v250_v63, %v242_v62 }
  0x46   :  { %v267_v9 = vld [vmem:[#allocation10 + $0x548] sm:$0xff]  ;;  %v269_v11 = vld [vmem:[#allocation10 + $0x558] sm:$0xff]  ;;  %v1287_v13 = vpack.c.bf16 %v252_v7, %v244_v6  ;;  %v258_v14 = vld [vmem:[#allocation10 + $0x500] sm:$0xff] }
  0x47   :  { %1212 = vmatpush1.bf16.msra.mxu0 %v1211_v36  ;;  %v266_v15 = vld [vmem:[#allocation10 + $0x540] sm:$0xff]  ;;  %v1225_v16 = vpack.c.bf16 %v267_v9, %v259_v8  ;;  %v1289_v17 = vpack.c.bf16 %v269_v11, %v261_v10  ;;  %v260_v18 = vld [vmem:[#allocation10 + $0x510] sm:$0xff]  ;;  %v275_v20 = vld [vmem:[#allocation10 + $0x588] sm:$0xff] }
  0x48   :  { %1276 = vmatpush1.bf16.msra.mxu1 %v1275_v37  ;;  %1214 = vmatprep.subr.bf16.mxu0 %v1213_v40  ;;  %v268_v19 = vld [vmem:[#allocation10 + $0x550] sm:$0xff]  ;;  %v283_v21 = vld [vmem:[#allocation10 + $0x5c8] sm:$0xff]  ;;  %v277_v22 = vld [vmem:[#allocation10 + $0x598] sm:$0xff]  ;;  %v1227_v24 = vpack.c.bf16 %v266_v15, %v258_v14 }
  0x49   :  { %1278 = vmatprep.subr.bf16.mxu1 %v1277_v41  ;;  %v285_v23 = vld [vmem:[#allocation10 + $0x5d8] sm:$0xff]  ;;  %v1291_v25 = vpack.c.bf16 %v268_v19, %v260_v18  ;;  %v274_v26 = vld [vmem:[#allocation10 + $0x580] sm:$0xff]  ;;  %v1229_v28 = vpack.c.bf16 %v283_v21, %v275_v20  ;;  %v276_v30 = vld [vmem:[#allocation10 + $0x590] sm:$0xff] }
  0x4a   :  { %v282_v27 = vld [vmem:[#allocation10 + $0x5c0] sm:$0xff]  ;;  %v1293_v29 = vpack.c.bf16 %v285_v23, %v277_v22  ;;  %v284_v31 = vld [vmem:[#allocation10 + $0x5d0] sm:$0xff]  ;;  %v291_v32 = vld [vmem:[#allocation10 + $0x608] sm:$0xff] }
  0x4b   :  { %1216 = vmatpush1.bf16.msra.mxu0 %v1215_v48  ;;  %v299_v33 = vld [vmem:[#allocation10 + $0x648] sm:$0xff]  ;;  %v293_v34 = vld [vmem:[#allocation10 + $0x618] sm:$0xff]  ;;  %v1231_v36 = vpack.c.bf16 %v282_v27, %v274_v26  ;;  %v1295_v37 = vpack.c.bf16 %v284_v31, %v276_v30  ;;  %v290_v38 = vld [vmem:[#allocation10 + $0x600] sm:$0xff] }
  0x4c   :  { %1280 = vmatpush1.bf16.msra.mxu1 %v1279_v49  ;;  %1218 = vmatprep.subr.bf16.mxu0 %v1217_v52  ;;  %v301_v35 = vld [vmem:[#allocation10 + $0x658] sm:$0xff]  ;;  %v298_v39 = vld [vmem:[#allocation10 + $0x640] sm:$0xff]  ;;  %v1233_v40 = vpack.c.bf16 %v299_v33, %v291_v32  ;;  %v292_v42 = vld [vmem:[#allocation10 + $0x610] sm:$0xff] }
  0x4d   :  { %1282 = vmatprep.subr.bf16.mxu1 %v1281_v53  ;;  %v1297_v41 = vpack.c.bf16 %v301_v35, %v293_v34  ;;  %v300_v43 = vld [vmem:[#allocation10 + $0x650] sm:$0xff]  ;;  %v307_v44 = vld [vmem:[#allocation10 + $0x688] sm:$0xff]  ;;  %v309_v46 = vld [vmem:[#allocation10 + $0x698] sm:$0xff]  ;;  %v1235_v48 = vpack.c.bf16 %v298_v39, %v290_v38 }
  0x4e   :  { %v315_v45 = vld [vmem:[#allocation10 + $0x6c8] sm:$0xff]  ;;  %v317_v47 = vld [vmem:[#allocation10 + $0x6d8] sm:$0xff]  ;;  %v1299_v49 = vpack.c.bf16 %v300_v43, %v292_v42  ;;  %v306_v50 = vld [vmem:[#allocation10 + $0x680] sm:$0xff] }
  0x4f   :  { %1220 = vmatpush1.bf16.msra.mxu0 %v1219_v60  ;;  %v314_v51 = vld [vmem:[#allocation10 + $0x6c0] sm:$0xff]  ;;  %v1237_v52 = vpack.c.bf16 %v315_v45, %v307_v44  ;;  %v1301_v53 = vpack.c.bf16 %v317_v47, %v309_v46  ;;  %v308_v54 = vld [vmem:[#allocation10 + $0x690] sm:$0xff]  ;;  %v323_v56 = vld [vmem:[#allocation10 + $0x708] sm:$0xff] }
  0x50   :  { %1284 = vmatpush1.bf16.msra.mxu1 %v1283_v61  ;;  %1222 = vmatprep.subr.bf16.mxu0 %v1221_v3  ;;  %v316_v55 = vld [vmem:[#allocation10 + $0x6d0] sm:$0xff]  ;;  %v331_v57 = vld [vmem:[#allocation10 + $0x748] sm:$0xff]  ;;  %v325_v58 = vld [vmem:[#allocation10 + $0x718] sm:$0xff]  ;;  %v1239_v60 = vpack.c.bf16 %v314_v51, %v306_v50 }
  0x51   :  { %1286 = vmatprep.subr.bf16.mxu1 %v1285_v4  ;;  %v333_v59 = vld [vmem:[#allocation10 + $0x758] sm:$0xff]  ;;  %v1303_v61 = vpack.c.bf16 %v316_v55, %v308_v54  ;;  %v322_v62 = vld [vmem:[#allocation10 + $0x700] sm:$0xff]  ;;  %v1241_v3 = vpack.c.bf16 %v331_v57, %v323_v56  ;;  %v324_v6 = vld [vmem:[#allocation10 + $0x710] sm:$0xff] }
  0x52   :  { %v330_v63 = vld [vmem:[#allocation10 + $0x740] sm:$0xff]  ;;  %v1305_v4 = vpack.c.bf16 %v333_v59, %v325_v58  ;;  %v332_v7 = vld [vmem:[#allocation10 + $0x750] sm:$0xff]  ;;  %v339_v8 = vld [vmem:[#allocation10 + $0x788] sm:$0xff] }
  0x53   :  { %1224 = vmatpush1.bf16.msra.mxu0 %v1223_v12  ;;  %v347_v9 = vld [vmem:[#allocation10 + $0x7c8] sm:$0xff]  ;;  %v341_v10 = vld [vmem:[#allocation10 + $0x798] sm:$0xff]  ;;  %v1243_v12 = vpack.c.bf16 %v330_v63, %v322_v62  ;;  %v338_v14 = vld [vmem:[#allocation10 + $0x780] sm:$0xff] }
  0x54   :  { %1288 = vmatpush1.bf16.msra.mxu1 %v1287_v13  ;;  %1226 = vmatprep.subr.bf16.mxu0 %v1225_v16  ;;  %v349_v11 = vld [vmem:[#allocation10 + $0x7d8] sm:$0xff]  ;;  %v1307_v13 = vpack.c.bf16 %v332_v7, %v324_v6  ;;  %v346_v15 = vld [vmem:[#allocation10 + $0x7c0] sm:$0xff]  ;;  %v1245_v16 = vpack.c.bf16 %v347_v9, %v339_v8  ;;  %v340_v18 = vld [vmem:[#allocation10 + $0x790] sm:$0xff] }
  0x55   :  { %1290 = vmatprep.subr.bf16.mxu1 %v1289_v17  ;;  %v1309_v17 = vpack.c.bf16 %v349_v11, %v341_v10  ;;  %v348_v19 = vld [vmem:[#allocation10 + $0x7d0] sm:$0xff]  ;;  %v103_v20 = vld [vmem:[#allocation10 + $0x28] sm:$0xff]  ;;  %v105_v22 = vld [vmem:[#allocation10 + $0x38] sm:$0xff] }
  0x56   :  { %v111_v21 = vld [vmem:[#allocation10 + $0x68] sm:$0xff]  ;;  %v113_v23 = vld [vmem:[#allocation10 + $0x78] sm:$0xff]  ;;  %v102_v35 = vld [vmem:[#allocation10 + $0x20] sm:$0xff] }
  0x57   :  { %1228 = vmatpush1.bf16.msra.mxu0 %v1227_v24  ;;  %v1247_v24 = vpack.c.bf16 %v346_v15, %v338_v14  ;;  %v1313_v26 = vpack.c.bf16 %v111_v21, %v103_v20  ;;  %v1377_v27 = vpack.c.bf16 %v113_v23, %v105_v22  ;;  %v1745_v30 = vld [vmem:[%s2273_s2 + $0x8] sm:$0xff]  ;;  %v112_v38 = vld [vmem:[#allocation10 + $0x70] sm:$0xff]  ;;  %v129_v42 = vld [vmem:[#allocation10 + $0xf8] sm:$0xff] }
  0x58   :  { %1292 = vmatpush1.bf16.msra.mxu1 %v1291_v25  ;;  %1230 = vmatprep.subr.bf16.mxu0 %v1229_v28  ;;  %v1311_v25 = vpack.c.bf16 %v348_v19, %v340_v18  ;;  %v1737_v28 = vld [vmem:[%s2273_s2] sm:$0xff]  ;;  %v119_v39 = vld [vmem:[#allocation10 + $0xa8] sm:$0xff]  ;;  %v145_v57 = vld [vmem:[#allocation10 + $0x178] sm:$0xff]  ;;  %s1653_s2 = smov [#allocation12]  }
  0x59   :  { %1294 = vmatprep.subr.bf16.mxu1 %v1293_v29  ;;  %v1650_v29 = vmov 0   ;;  %v135_v54 = vld [vmem:[#allocation10 + $0x128] sm:$0xff]  ;;  %v142_v62 = vld [vmem:[#allocation10 + $0x160] sm:$0xff]  ;;  %v136_v63 = vld [vmem:[#allocation10 + $0x130] sm:$0xff]  ;;  %s1121_s27 = sshll.u32 %s1653_s2, 4  ;;  %s1122_s27 = int_to_ptr.vmem [resolvable:$true] %s1121_s27 }
  0x5a   :  { %1456 = vset.pattern.permute.xlu1 %v1650_v29  ;;  %92 = vst.msk [vmem:[#allocation6] sm:$0xff] %vm2279_vm0, %v1650_v29  ;;  %93 = vst.msk [vmem:[#allocation6 + $0x8] sm:$0xff] %vm2279_vm0, %v1650_v29  ;;  %1457 = vset.pattern.permute.xlu0 %v1650_v29  ;;  %v143_v56 = vld [vmem:[#allocation10 + $0x168] sm:$0xff]  ;;  %v161_v9 = vld [vmem:[#allocation10 + $0x1f8] sm:$0xff]  ;;  %s1546_s28 = scalar_lea.vmem %s1122_s27, 256  ;;  %p1551_p3 = scmp.lt.s32.totalorder %s1122_s27, %s1122_s27 }
  0x5b   :  { %1232 = vmatpush1.bf16.msra.mxu0 %v1231_v36  ;;  %685 = vperm.xlu1 %1456, %v1737_v28   ;;  %v110_v36 = vld [vmem:[#allocation10 + $0x60] sm:$0xff]  ;;  %v1321_v6 = vpack.c.bf16 %v143_v56, %v135_v54  ;;  %v159_v8 = vld [vmem:[#allocation10 + $0x1e8] sm:$0xff]  ;;  %v152_v15 = vld [vmem:[#allocation10 + $0x1b0] sm:$0xff]  ;;  %p1547_p2 = scmp.ne.s32.totalorder %s1122_s27, %s1546_s28  ;;  %p1552_p4 = scmp.lt.s32.totalorder %s1546_s28, %s1546_s28 }
  0x5c   :  { %1296 = vmatpush1.bf16.msra.mxu1 %v1295_v37  ;;  %1234 = vmatprep.subr.bf16.mxu0 %v1233_v40  ;;  %v104_v37 = vld [vmem:[#allocation10 + $0x30] sm:$0xff]  ;;  %v127_v40 = vld [vmem:[#allocation10 + $0xe8] sm:$0xff]  ;;  %v1315_v46 = vpack.c.bf16 %v110_v36, %v102_v35  ;;  %v150_v11 = vld [vmem:[#allocation10 + $0x1a0] sm:$0xff] }
  0x5d   :  { %1298 = vmatprep.subr.bf16.mxu1 %v1297_v41  ;;  %v121_v41 = vld [vmem:[#allocation10 + $0xb8] sm:$0xff]  ;;  %v1379_v47 = vpack.c.bf16 %v112_v38, %v104_v37  ;;  %v1317_v50 = vpack.c.bf16 %v127_v40, %v119_v39  ;;  %v175_v18 = vld [vmem:[#allocation10 + $0x268] sm:$0xff]  ;;  %v166_v23 = vld [vmem:[#allocation10 + $0x220] sm:$0xff]  ;;  %p1553_p5 = por %p1552_p4, %p1551_p3 }
  0x5e   :  { %v1381_v51 = vpack.c.bf16 %v129_v42, %v121_v41  ;;  %v169_v19 = vld [vmem:[#allocation10 + $0x238] sm:$0xff]  ;;  %v176_v29 = vld [vmem:[#allocation10 + $0x270] sm:$0xff]  ;;  %v182_v37 = vld [vmem:[#allocation10 + $0x2a0] sm:$0xff] }
  0x5f   :  { %1236 = vmatpush1.bf16.msra.mxu0 %v1235_v48  ;;  %688 = vperm.xlu1 %1456, %v1745_v30   ;;  %v118_v48 = vld [vmem:[#allocation10 + $0xa0] sm:$0xff]  ;;  %v177_v20 = vld [vmem:[#allocation10 + $0x278] sm:$0xff]  ;;  %v184_v41 = vld [vmem:[#allocation10 + $0x2b0] sm:$0xff]  ;;  %p1554_p6 = pnand %p1553_p5, %p1547_p2 }
  0x60   :  { %1300 = vmatpush1.bf16.msra.mxu1 %v1299_v49  ;;  %1238 = vmatprep.subr.bf16.mxu0 %v1237_v52  ;;  %v126_v49 = vld [vmem:[#allocation10 + $0xe0] sm:$0xff]  ;;  %v120_v52 = vld [vmem:[#allocation10 + $0xb0] sm:$0xff]  ;;  %v223_v56 = vld [vmem:[#allocation10 + $0x3e8] sm:$0xff] }
  0x61   :  { %1302 = vmatprep.subr.bf16.mxu1 %v1301_v53  ;;  %v128_v53 = vld [vmem:[#allocation10 + $0xf0] sm:$0xff]  ;;  %v190_v38 = vld [vmem:[#allocation10 + $0x2e0] sm:$0xff] }
  0x62   :  { %v192_v42 = vld [vmem:[#allocation10 + $0x2f0] sm:$0xff] }
  0x63   :  { %1240 = vmatpush1.bf16.msra.mxu0 %v1239_v60  ;;  %v1383_v60 = vpack.c.bf16 %v128_v53, %v120_v52  ;;  %v200_v54 = vld [vmem:[#allocation10 + $0x330] sm:$0xff] }
  0x64   :  { %1304 = vmatpush1.bf16.msra.mxu1 %v1303_v61  ;;  %1242 = vmatprep.subr.bf16.mxu0 %v1241_v3  ;;  %v134_v61 = vld [vmem:[#allocation10 + $0x120] sm:$0xff]  ;;  %v144_v3 = vld [vmem:[#allocation10 + $0x170] sm:$0xff] }
  0x65   :  { %1306 = vmatprep.subr.bf16.mxu1 %v1305_v4  ;;  %v151_v4 = vld [vmem:[#allocation10 + $0x1a8] sm:$0xff]  ;;  %v1387_v10 = vpack.c.bf16 %v144_v3, %v136_v63  ;;  %v222_v63 = vld [vmem:[#allocation10 + $0x3e0] sm:$0xff] }
  0x67   :  { %1244 = vmatpush1.bf16.msra.mxu0 %v1243_v12  ;;  %v158_v12 = vld [vmem:[#allocation10 + $0x1e0] sm:$0xff] }
  0x68   :  { %1308 = vmatpush1.bf16.msra.mxu1 %v1307_v13  ;;  %1246 = vmatprep.subr.bf16.mxu0 %v1245_v16  ;;  %v1325_v13 = vpack.c.bf16 %v159_v8, %v151_v4  ;;  %v160_v16 = vld [vmem:[#allocation10 + $0x1f0] sm:$0xff]  ;;  %v1327_v21 = vpack.c.bf16 %v158_v12, %v150_v11  ;;  %v231_v8 = vld [vmem:[#allocation10 + $0x428] sm:$0xff]  ;;  %v230_v12 = vld [vmem:[#allocation10 + $0x420] sm:$0xff] }
  0x69   :  { %1310 = vmatprep.subr.bf16.mxu1 %v1309_v17  ;;  %v167_v17 = vld [vmem:[#allocation10 + $0x228] sm:$0xff]  ;;  %v1391_v22 = vpack.c.bf16 %v160_v16, %v152_v15  ;;  %v232_v16 = vld [vmem:[#allocation10 + $0x430] sm:$0xff] }
  0x6b   :  { %1248 = vmatpush1.bf16.msra.mxu0 %v1247_v24  ;;  %v174_v24 = vld [vmem:[#allocation10 + $0x260] sm:$0xff] }
  0x6c   :  { %1312 = vmatpush1.bf16.msra.mxu1 %v1311_v25  ;;  %1314 = vmatprep.subr.bf16.mxu0 %v1313_v26  ;;  %v1329_v25 = vpack.c.bf16 %v175_v18, %v167_v17  ;;  %v1393_v26 = vpack.c.bf16 %v177_v20, %v169_v19  ;;  %v1331_v35 = vpack.c.bf16 %v174_v24, %v166_v23  ;;  %v240_v17 = vld [vmem:[#allocation10 + $0x470] sm:$0xff]  ;;  %v247_v18 = vld [vmem:[#allocation10 + $0x4a8] sm:$0xff]  ;;  %v249_v20 = vld [vmem:[#allocation10 + $0x4b8] sm:$0xff] }
  0x6d   :  { %1378 = vmatprep.subr.bf16.mxu1 %v1377_v27  ;;  %v168_v27 = vld [vmem:[#allocation10 + $0x230] sm:$0xff]  ;;  %v255_v19 = vld [vmem:[#allocation10 + $0x4e8] sm:$0xff]  ;;  %v1411_v23 = vpack.c.bf16 %v240_v17, %v232_v16  ;;  %v246_v24 = vld [vmem:[#allocation10 + $0x4a0] sm:$0xff] }
  0x6e   :  { %v1395_v36 = vpack.c.bf16 %v176_v29, %v168_v27  ;;  %v248_v29 = vld [vmem:[#allocation10 + $0x4b0] sm:$0xff] }
  0x6f   :  { %v312_v17 = vld [vmem:[#allocation10 + $0x6b0] sm:$0xff] }
  0xbb   :  { %v69_v31 = vpop.xlane.xlu0 %68 }
  0xbc   :  { %v73_v32 = vmax.f32 %v69_v31, 1e-24  ;;  %v183_v31 = vld [vmem:[#allocation10 + $0x2a8] sm:$0xff] }
  0xbe   :  { %1458 = vrsqrt.f32 %v73_v32  ;;  %v191_v32 = vld [vmem:[#allocation10 + $0x2e8] sm:$0xff] }
  0xbf   :  { %v72_v33 = vpop.xlane.xlu0 %71  ;;  %v1333_v39 = vpack.c.bf16 %v191_v32, %v183_v31  ;;  %v256_v31 = vld [vmem:[#allocation10 + $0x4f0] sm:$0xff]  ;;  %v263_v32 = vld [vmem:[#allocation10 + $0x528] sm:$0xff] }
  0xc0   :  { %v74_v34 = vmax.f32 %v72_v33, 1e-24  ;;  %v185_v33 = vld [vmem:[#allocation10 + $0x2b8] sm:$0xff] }
  0xc2   :  { %1460 = vrsqrt.f32 %v74_v34  ;;  %v193_v34 = vld [vmem:[#allocation10 + $0x2f8] sm:$0xff] }
  0xc3   :  { %v1397_v40 = vpack.c.bf16 %v193_v34, %v185_v33  ;;  %v271_v33 = vld [vmem:[#allocation10 + $0x568] sm:$0xff]  ;;  %v265_v34 = vld [vmem:[#allocation10 + $0x538] sm:$0xff] }
  0xc8   :  { %v1459_v43 = vpop.eup %1458 }
  0xc9   :  { %v78_v44 = vmul.f32 %v1459_v43, %v1720_v1  ;;  %v1750_v45 = vmul.f32 %v1459_v43, %v1718_v0  ;;  %v1319_v1 = vpack.c.bf16 %v126_v49, %v118_v48  ;;  %v137_v0 = vld [vmem:[#allocation10 + $0x138] sm:$0xff]  ;;  %v199_v43 = vld [vmem:[#allocation10 + $0x328] sm:$0xff]  ;;  %v1335_v48 = vpack.c.bf16 %v190_v38, %v182_v37  ;;  %v262_v38 = vld [vmem:[#allocation10 + $0x520] sm:$0xff] }
  0xca   :  { %v1385_v7 = vpack.c.bf16 %v145_v57, %v137_v0  ;;  %v1399_v49 = vpack.c.bf16 %v192_v42, %v184_v41  ;;  %v217_v0 = vld [vmem:[#allocation10 + $0x3b8] sm:$0xff]  ;;  %v1415_v37 = vpack.c.bf16 %v256_v31, %v248_v29  ;;  %v264_v42 = vld [vmem:[#allocation10 + $0x530] sm:$0xff] }
  0xcb   :  { %418 = vmatprep.mubr.f32.mxu0 %v78_v44  ;;  %495 = vmatprep.mubr.f32.mxu1 %v78_v44  ;;  %v225_v57 = vld [vmem:[#allocation10 + $0x3f8] sm:$0xff]  ;;  %v328_v31 = vld [vmem:[#allocation10 + $0x730] sm:$0xff] }
  0xcc   :  { %v1461_v55 = vpop.eup %1460  ;;  %419 = vmatmul.mubr.f32.vlgmr.msra.gmra.mrb[0].mxu0 %v1750_v45  ;;  %496 = vmatmul.mubr.f32.vlgmr.msra.gmra.mrb[0].mxu1 %v1750_v45  ;;  %v1405_v4 = vpack.c.bf16 %v225_v57, %v217_v0  ;;  %v303_v0 = vld [vmem:[#allocation10 + $0x668] sm:$0xff]  ;;  %v297_v57 = vld [vmem:[#allocation10 + $0x638] sm:$0xff] }
  0xcd   :  { %1316 = vmatpush1.bf16.msra.mxu0 %v1315_v46  ;;  %1380 = vmatpush1.bf16.msra.mxu1 %v1379_v47  ;;  %v1755_v58 = vmul.f32 %v1461_v55, %v1728_v5  ;;  %v1758_v59 = vmul.f32 %v1461_v55, %v1722_v2  ;;  %v153_v5 = vld [vmem:[#allocation10 + $0x1b8] sm:$0xff]  ;;  %v1323_v2 = vpack.c.bf16 %v142_v62, %v134_v61  ;;  %v208_v55 = vld [vmem:[#allocation10 + $0x370] sm:$0xff]  ;;  %v214_v62 = vld [vmem:[#allocation10 + $0x3a0] sm:$0xff] }
  0xce   :  { %1318 = vmatprep.subr.bf16.mxu0 %v1317_v50  ;;  %1382 = vmatprep.subr.bf16.mxu1 %v1381_v51  ;;  %v1389_v14 = vpack.c.bf16 %v161_v9, %v153_v5  ;;  %v201_v46 = vld [vmem:[#allocation10 + $0x338] sm:$0xff]  ;;  %v198_v50 = vld [vmem:[#allocation10 + $0x320] sm:$0xff]  ;;  %v1403_v61 = vpack.c.bf16 %v208_v55, %v200_v54  ;;  %v239_v5 = vld [vmem:[#allocation10 + $0x468] sm:$0xff] }
  0xcf   :  { %424 = vmatprep.mubr.f32.mxu0 %v1755_v58  ;;  %501 = vmatprep.mubr.f32.mxu1 %v1755_v58  ;;  %v209_v47 = vld [vmem:[#allocation10 + $0x378] sm:$0xff]  ;;  %v206_v51 = vld [vmem:[#allocation10 + $0x360] sm:$0xff]  ;;  %v280_v55 = vld [vmem:[#allocation10 + $0x5b0] sm:$0xff] }
  0xd0   :  { %425 = vmatmul.mubr.f32.gmra.mrb[2].mxu0 %v1758_v59  ;;  %502 = vmatmul.mubr.f32.gmra.mrb[2].mxu1 %v1758_v59  ;;  %v1401_v53 = vpack.c.bf16 %v209_v47, %v201_v46  ;;  %v233_v9 = vld [vmem:[#allocation10 + $0x438] sm:$0xff]  ;;  %v287_v46 = vld [vmem:[#allocation10 + $0x5e8] sm:$0xff] }
  0xd1   :  { %1320 = vmatpush1.bf16.msra.mxu0 %v1319_v1  ;;  %1384 = vmatpush1.bf16.msra.mxu1 %v1383_v60  ;;  %v215_v1 = vld [vmem:[#allocation10 + $0x3a8] sm:$0xff]  ;;  %v1339_v60 = vpack.c.bf16 %v206_v51, %v198_v50  ;;  %v281_v47 = vld [vmem:[#allocation10 + $0x5b8] sm:$0xff]  ;;  %v278_v51 = vld [vmem:[#allocation10 + $0x5a0] sm:$0xff] }
  0xd2   :  { %572 = vmatprep.mubr.f32.mxu0 %v78_v44  ;;  %649 = vmatprep.mubr.f32.mxu1 %v78_v44  ;;  %v207_v44 = vld [vmem:[#allocation10 + $0x368] sm:$0xff]  ;;  %v1341_v3 = vpack.c.bf16 %v223_v56, %v215_v1  ;;  %v288_v1 = vld [vmem:[#allocation10 + $0x5f0] sm:$0xff] }
  0xd3   :  { %1322 = vmatprep.subr.bf16.mxu0 %v1321_v6  ;;  %1386 = vmatprep.subr.bf16.mxu1 %v1385_v7  ;;  %v1337_v52 = vpack.c.bf16 %v207_v44, %v199_v43  ;;  %v216_v6 = vld [vmem:[#allocation10 + $0x3b0] sm:$0xff]  ;;  %v279_v44 = vld [vmem:[#allocation10 + $0x5a8] sm:$0xff] }
  0xd4   :  { %v224_v7 = vld [vmem:[#allocation10 + $0x3f0] sm:$0xff]  ;;  %v295_v56 = vld [vmem:[#allocation10 + $0x628] sm:$0xff] }
  0xd5   :  { %1324 = vmatpush1.bf16.msra.mxu0 %v1323_v2  ;;  %1388 = vmatpush1.bf16.msra.mxu1 %v1387_v10  ;;  %v241_v2 = vld [vmem:[#allocation10 + $0x478] sm:$0xff]  ;;  %v1343_v10 = vpack.c.bf16 %v222_v63, %v214_v62  ;;  %v1407_v11 = vpack.c.bf16 %v224_v7, %v216_v6  ;;  %v272_v43 = vld [vmem:[#allocation10 + $0x570] sm:$0xff]  ;;  %v1423_v62 = vpack.c.bf16 %v288_v1, %v280_v55  ;;  %v294_v63 = vld [vmem:[#allocation10 + $0x620] sm:$0xff] }
  0xd6   :  { %1326 = vmatprep.subr.bf16.mxu0 %v1325_v13  ;;  %1390 = vmatprep.subr.bf16.mxu1 %v1389_v14  ;;  %v238_v13 = vld [vmem:[#allocation10 + $0x460] sm:$0xff]  ;;  %v1345_v14 = vpack.c.bf16 %v239_v5, %v231_v8  ;;  %v1409_v15 = vpack.c.bf16 %v241_v2, %v233_v9  ;;  %v1419_v50 = vpack.c.bf16 %v272_v43, %v264_v42  ;;  %v296_v7 = vld [vmem:[#allocation10 + $0x630] sm:$0xff]  ;;  %v311_v5 = vld [vmem:[#allocation10 + $0x6a8] sm:$0xff] }
  0xd7   :  { %v304_v8 = vld [vmem:[#allocation10 + $0x670] sm:$0xff]  ;;  %v319_v9 = vld [vmem:[#allocation10 + $0x6e8] sm:$0xff]  ;;  %v313_v2 = vld [vmem:[#allocation10 + $0x6b8] sm:$0xff] }
  0xd8   :  { %v350_v42 = vld [vmem:[#allocation10 + $0x7e0] sm:$0xff]  ;;  %v344_v43 = vld [vmem:[#allocation10 + $0x7b0] sm:$0xff] }
  0xd9   :  { %1328 = vmatpush1.bf16.msra.mxu0 %v1327_v21  ;;  %1392 = vmatpush1.bf16.msra.mxu1 %v1391_v22  ;;  %v257_v21 = vld [vmem:[#allocation10 + $0x4f8] sm:$0xff]  ;;  %v1347_v22 = vpack.c.bf16 %v238_v13, %v230_v12  ;;  %v1427_v12 = vpack.c.bf16 %v304_v8, %v296_v7  ;;  %v310_v13 = vld [vmem:[#allocation10 + $0x6a0] sm:$0xff] }
  0xda   :  { %1330 = vmatprep.subr.bf16.mxu0 %v1329_v25  ;;  %1394 = vmatprep.subr.bf16.mxu1 %v1393_v26  ;;  %v254_v25 = vld [vmem:[#allocation10 + $0x4e0] sm:$0xff]  ;;  %v1349_v26 = vpack.c.bf16 %v255_v19, %v247_v18  ;;  %v1413_v27 = vpack.c.bf16 %v257_v21, %v249_v20  ;;  %v320_v18 = vld [vmem:[#allocation10 + $0x6f0] sm:$0xff]  ;;  %v327_v19 = vld [vmem:[#allocation10 + $0x728] sm:$0xff] }
  0xdb   :  { %v335_v20 = vld [vmem:[#allocation10 + $0x768] sm:$0xff]  ;;  %v329_v21 = vld [vmem:[#allocation10 + $0x738] sm:$0xff] }
  0xdd   :  { %1332 = vmatpush1.bf16.msra.mxu0 %v1331_v35  ;;  %1396 = vmatpush1.bf16.msra.mxu1 %v1395_v36  ;;  %v273_v35 = vld [vmem:[#allocation10 + $0x578] sm:$0xff]  ;;  %v1351_v36 = vpack.c.bf16 %v254_v25, %v246_v24  ;;  %v1431_v24 = vpack.c.bf16 %v320_v18, %v312_v17  ;;  %v326_v25 = vld [vmem:[#allocation10 + $0x720] sm:$0xff] }
  0xde   :  { %1334 = vmatprep.subr.bf16.mxu0 %v1333_v39  ;;  %1398 = vmatprep.subr.bf16.mxu1 %v1397_v40  ;;  %v270_v39 = vld [vmem:[#allocation10 + $0x560] sm:$0xff]  ;;  %v1353_v40 = vpack.c.bf16 %v271_v33, %v263_v32  ;;  %v1417_v41 = vpack.c.bf16 %v273_v35, %v265_v34  ;;  %v336_v32 = vld [vmem:[#allocation10 + $0x770] sm:$0xff]  ;;  %v343_v33 = vld [vmem:[#allocation10 + $0x7a8] sm:$0xff] }
  0xdf   :  { %v351_v34 = vld [vmem:[#allocation10 + $0x7e8] sm:$0xff]  ;;  %v345_v35 = vld [vmem:[#allocation10 + $0x7b8] sm:$0xff] }
  0xe1   :  { %1336 = vmatpush1.bf16.msra.mxu0 %v1335_v48  ;;  %1400 = vmatpush1.bf16.msra.mxu1 %v1399_v49  ;;  %v289_v48 = vld [vmem:[#allocation10 + $0x5f8] sm:$0xff]  ;;  %v1355_v49 = vpack.c.bf16 %v270_v39, %v262_v38  ;;  %v1435_v38 = vpack.c.bf16 %v336_v32, %v328_v31  ;;  %v342_v39 = vld [vmem:[#allocation10 + $0x7a0] sm:$0xff] }
  0xe2   :  { %1338 = vmatprep.subr.bf16.mxu0 %v1337_v52  ;;  %1402 = vmatprep.subr.bf16.mxu1 %v1401_v53  ;;  %v286_v52 = vld [vmem:[#allocation10 + $0x5e0] sm:$0xff]  ;;  %v1357_v53 = vpack.c.bf16 %v287_v46, %v279_v44  ;;  %v1421_v54 = vpack.c.bf16 %v289_v48, %v281_v47  ;;  %v352_v44 = vld [vmem:[#allocation10 + $0x7f0] sm:$0xff]  ;;  %v1375_v46 = vpack.c.bf16 %v350_v42, %v342_v39  ;;  %v666_v48 = vlaneseq }
  0xe3   :  { %v1439_v47 = vpack.c.bf16 %v352_v44, %v344_v43  ;;  %v1651_v42 = vmov 0.0  }
  0xe4   :  { %90 = vst.msk [vmem:[#allocation5] sm:$0xff] %vm2279_vm0, %v1651_v42  ;;  %88 = vst.msk [vmem:[#allocation4] sm:$0xff] %vm2279_vm0, %v1651_v42 }
  0xe5   :  { %1340 = vmatpush1.bf16.msra.mxu0 %v1339_v60  ;;  %1404 = vmatpush1.bf16.msra.mxu1 %v1403_v61  ;;  %v305_v60 = vld [vmem:[#allocation10 + $0x678] sm:$0xff]  ;;  %v1359_v61 = vpack.c.bf16 %v286_v52, %v278_v51  ;;  %89 = vst.msk [vmem:[#allocation4 + $0x8] sm:$0xff] %vm2279_vm0, %v1651_v42  ;;  %91 = vst.msk [vmem:[#allocation5 + $0x8] sm:$0xff] %vm2279_vm0, %v1651_v42 }
  0xe6   :  { %1342 = vmatprep.subr.bf16.mxu0 %v1341_v3  ;;  %1406 = vmatprep.subr.bf16.mxu1 %v1405_v4  ;;  %v302_v3 = vld [vmem:[#allocation10 + $0x660] sm:$0xff]  ;;  %v1361_v4 = vpack.c.bf16 %v303_v0, %v295_v56  ;;  %v1425_v6 = vpack.c.bf16 %v305_v60, %v297_v57 }
  0xe9   :  { %1344 = vmatpush1.bf16.msra.mxu0 %v1343_v10  ;;  %1408 = vmatpush1.bf16.msra.mxu1 %v1407_v11  ;;  %v321_v10 = vld [vmem:[#allocation10 + $0x6f8] sm:$0xff]  ;;  %v1363_v11 = vpack.c.bf16 %v302_v3, %v294_v63 }
  0xea   :  { %1346 = vmatprep.subr.bf16.mxu0 %v1345_v14  ;;  %1410 = vmatprep.subr.bf16.mxu1 %v1409_v15  ;;  %v318_v14 = vld [vmem:[#allocation10 + $0x6e0] sm:$0xff]  ;;  %v1365_v15 = vpack.c.bf16 %v319_v9, %v311_v5  ;;  %v1429_v16 = vpack.c.bf16 %v321_v10, %v313_v2 }
  0xed   :  { %1348 = vmatpush1.bf16.msra.mxu0 %v1347_v22  ;;  %1412 = vmatpush1.bf16.msra.mxu1 %v1411_v23  ;;  %v337_v22 = vld [vmem:[#allocation10 + $0x778] sm:$0xff]  ;;  %v1367_v23 = vpack.c.bf16 %v318_v14, %v310_v13 }
  0xee   :  { %1350 = vmatprep.subr.bf16.mxu0 %v1349_v26  ;;  %1414 = vmatprep.subr.bf16.mxu1 %v1413_v27  ;;  %v334_v26 = vld [vmem:[#allocation10 + $0x760] sm:$0xff]  ;;  %v1369_v27 = vpack.c.bf16 %v335_v20, %v327_v19  ;;  %v1433_v29 = vpack.c.bf16 %v337_v22, %v329_v21 }
  0xf1   :  { %1352 = vmatpush1.bf16.msra.mxu0 %v1351_v36  ;;  %1416 = vmatpush1.bf16.msra.mxu1 %v1415_v37  ;;  %v353_v36 = vld [vmem:[#allocation10 + $0x7f8] sm:$0xff]  ;;  %v1371_v37 = vpack.c.bf16 %v334_v26, %v326_v25 }
  0xf2   :  { %1354 = vmatprep.subr.bf16.mxu0 %v1353_v40  ;;  %1418 = vmatprep.subr.bf16.mxu1 %v1417_v41  ;;  %v1373_v40 = vpack.c.bf16 %v351_v34, %v343_v33  ;;  %v1437_v41 = vpack.c.bf16 %v353_v36, %v345_v35 }
  0xf5   :  { %1356 = vmatpush1.bf16.msra.mxu0 %v1355_v49  ;;  %1420 = vmatpush1.bf16.msra.mxu1 %v1419_v50  ;;  %v1770_v49 = vand.u32 127, %v666_v48  ;;  %v1772_v50 = vpop.permute.xlu1 %685 }
  0xf6   :  { %1358 = vmatprep.subr.bf16.mxu0 %v1357_v53  ;;  %1422 = vmatprep.subr.bf16.mxu1 %v1421_v54 }
  0xf7   :  { %v1775_v51 = vadd.s32 128, %v1770_v49  ;;  %v1778_v52 = vadd.s32 256, %v1770_v49  ;;  %vm690_vm1 = vcmp.eq.s32.totalorder %v1770_v49, %v1772_v50  ;;  %v1853_v13 = vadd.s32 640, %v1770_v49 }
  0xf8   :  { %v1866_v17 = vadd.s32 768, %v1770_v49  ;;  %v1879_v22 = vadd.s32 896, %v1770_v49 }
  0xf9   :  { %1360 = vmatpush1.bf16.msra.mxu0 %v1359_v61  ;;  %1424 = vmatpush1.bf16.msra.mxu1 %v1423_v62  ;;  %vm691_vm2 = vcmp.eq.s32.totalorder %v1775_v51, %v1772_v50  ;;  %vm692_vm3 = vcmp.eq.s32.totalorder %v1778_v52, %v1772_v50  ;;  %vm695_vm10 = vcmp.eq.s32.totalorder %v1853_v13, %v1772_v50 }
  0xfa   :  { %1362 = vmatprep.subr.bf16.mxu0 %v1361_v4  ;;  %1426 = vmatprep.subr.bf16.mxu1 %v1425_v6  ;;  %vm2284_vm12 = vcmp.eq.s32.totalorder %v1866_v17, %v1772_v50  ;;  %vm2283_vm14 = vcmp.eq.s32.totalorder %v1879_v22, %v1772_v50  ;;  %vm793_vm0 = vcmp.lt.s32.totalorder %v1879_v22, 1000 }
  0xfd   :  { %1364 = vmatpush1.bf16.msra.mxu0 %v1363_v11  ;;  %1428 = vmatpush1.bf16.msra.mxu1 %v1427_v12  ;;  %v1850_v12 = vadd.s32 512, %v1770_v49 }
  0xfe   :  { %1366 = vmatprep.subr.bf16.mxu0 %v1365_v15  ;;  %1430 = vmatprep.subr.bf16.mxu1 %v1429_v16 }
  0xff   :  { %vm694_vm9 = vcmp.eq.s32.totalorder %v1850_v12, %v1772_v50 }
 0x101   :  { %1368 = vmatpush1.bf16.msra.mxu0 %v1367_v23  ;;  %1432 = vmatpush1.bf16.msra.mxu1 %v1431_v24 }
 0x102   :  { %1370 = vmatprep.subr.bf16.mxu0 %v1369_v27  ;;  %1434 = vmatprep.subr.bf16.mxu1 %v1433_v29 }
 0x105   :  { %1372 = vmatpush1.bf16.msra.mxu0 %v1371_v37  ;;  %1436 = vmatpush1.bf16.msra.mxu1 %v1435_v38 }
 0x106   :  { %1374 = vmatprep.subr.bf16.mxu0 %v1373_v40  ;;  %1438 = vmatprep.subr.bf16.mxu1 %v1437_v41 }
 0x109   :  { %1376 = vmatpush1.bf16.msra.mxu0 %v1375_v46  ;;  %1440 = vmatpush1.bf16.msra.mxu1 %v1439_v47 }
 0x10c   :  { %573 = vmatmul.mubr.f32.vlgmr.msra.gmra.mrb[4].mxu0 %v1750_v45  ;;  %650 = vmatmul.mubr.f32.vlgmr.msra.gmra.mrb[4].mxu1 %v1750_v45  ;;  %v1785_v45 = vadd.s32 384, %v1770_v49 }
 0x10d   :  { %578 = vmatprep.mubr.f32.mxu0 %v1755_v58  ;;  %655 = vmatprep.mubr.f32.mxu1 %v1755_v58  ;;  %v1787_v58 = vpop.permute.xlu1 %688 }
 0x10e   :  { %vm698_vm4 = vcmp.eq.s32.totalorder %v1770_v49, %v1787_v58  ;;  %vm693_vm5 = vcmp.eq.s32.totalorder %v1785_v45, %v1772_v50  ;;  %vm2287_vm6 = vcmp.eq.s32.totalorder %v1775_v51, %v1787_v58  ;;  %vm2286_vm7 = vcmp.eq.s32.totalorder %v1778_v52, %v1787_v58 }
 0x10f   :  { %vm2285_vm8 = vcmp.eq.s32.totalorder %v1785_v45, %v1787_v58  ;;  %vm2282_vm11 = vcmp.eq.s32.totalorder %v1850_v12, %v1787_v58  ;;  %vm2278_vm13 = vcmp.eq.s32.totalorder %v1853_v13, %v1787_v58  ;;  %vm2281_vm15 = vcmp.eq.s32.totalorder %v1866_v17, %v1787_v58 }
 0x110   :  { %579 = vmatmul.mubr.f32.gmra.mrb[6].mxu0 %v1758_v59  ;;  %656 = vmatmul.mubr.f32.gmra.mrb[6].mxu1 %v1758_v59 }
 0x19f   :  { %v1789_v59 = vpop.f32.mrb[0].mxu0  ;;  %v1791_v53 = vpop.f32.mrb[0].mxu1 }
 0x1a0   :  { %v706_v54 = vsel %vm690_vm1, %v1789_v59, 0.0  ;;  %v1799_v55 = vpop.f32.mrb[1].mxu0  ;;  %v1801_v1 = vpop.f32.mrb[1].mxu1  ;;  %v708_v57 = vsel %vm692_vm3, %v1791_v53, 0.0 }
 0x1a1   :  { %v707_v56 = vsel %vm691_vm2, %v1799_v55, 0.0  ;;  %v709_v6 = vsel %vm693_vm5, %v1801_v1, 0.0 }
 0x1a2   :  { %v722_v0 = vadd.f32 %v707_v56, %v706_v54 }
 0x1a3   :  { %v1819_v60 = vpop.f32.mrb[2].mxu0  ;;  %v1821_v61 = vpop.f32.mrb[2].mxu1 }
 0x1a4   :  { %v723_v62 = vadd.f32 %v722_v0, %v708_v57  ;;  %v714_v63 = vsel %vm698_vm4, %v1819_v60, 0.0  ;;  %v1827_v3 = vpop.f32.mrb[3].mxu0  ;;  %v1829_v4 = vpop.f32.mrb[3].mxu1  ;;  %v716_v8 = vsel %vm2286_vm7, %v1821_v61, 0.0 }
 0x1a5   :  { %v715_v7 = vsel %vm2287_vm6, %v1827_v3, 0.0  ;;  %v717_v2 = vsel %vm2285_vm8, %v1829_v4, 0.0  ;;  %vm745_vm8 = vcmp.lt.s32.totalorder %v1745_v30, 1024 }
 0x1a6   :  { %v724_v5 = vadd.f32 %v723_v62, %v709_v6  ;;  %v731_v9 = vadd.f32 %v715_v7, %v714_v63  ;;  %v794_v6 = vmul.f32 30.0, %v1789_v59  ;;  %v803_v59 = vmul.f32 30.0, %v1827_v3 }
 0x1a8   :  { %v732_v10 = vadd.f32 %v731_v9, %v716_v8  ;;  %v796_v8 = vmul.f32 30.0, %v1791_v53 }
 0x1aa   :  { %v733_v11 = vadd.f32 %v732_v10, %v717_v2  ;;  %v797_v10 = vmul.f32 30.0, %v1801_v1  ;;  %v805_v1 = vmul.f32 30.0, %v1829_v4 }
 0x1df   :  { %v1855_v14 = vpop.f32.mrb[4].mxu0  ;;  %v1859_v15 = vpop.f32.mrb[4].mxu1 }
 0x1e0   :  { %v710_v16 = vsel %vm694_vm9, %v1855_v14, 0.0  ;;  %v1868_v18 = vpop.f32.mrb[5].mxu0  ;;  %v1872_v19 = vpop.f32.mrb[5].mxu1  ;;  %v712_v31 = vsel %vm2284_vm12, %v1859_v15, 0.0  ;;  %vm741_vm12 = vcmp.ge.s32.totalorder %v1745_v30, 0 }
 0x1e1   :  { %v725_v20 = vadd.f32 %v724_v5, %v710_v16  ;;  %v711_v21 = vsel %vm695_vm10, %v1868_v18, 0.0  ;;  %v713_v35 = vsel %vm2283_vm14, %v1872_v19, 0.0  ;;  %v795_v5 = vmul.f32 30.0, %v1799_v55 }
 0x1e2   :  { %v799_v4 = vmul.f32 30.0, %v1868_v18 }
 0x1e3   :  { %v726_v23 = vadd.f32 %v725_v20, %v711_v21  ;;  %v1881_v24 = vpop.f32.mrb[6].mxu0  ;;  %v1885_v25 = vpop.f32.mrb[6].mxu1 }
 0x1e4   :  { %v718_v26 = vsel %vm2282_vm11, %v1881_v24, 0.0  ;;  %v1893_v27 = vpop.f32.mrb[7].mxu0  ;;  %v1897_v29 = vpop.f32.mrb[7].mxu1  ;;  %v720_v37 = vsel %vm2281_vm15, %v1885_v25, 0.0  ;;  %vm740_vm15 = vcmp.ge.s32.totalorder %v1737_v28, 0  ;;  %vm744_vm11 = vcmp.lt.s32.totalorder %v1737_v28, 1024 }
 0x1e5   :  { %v734_v32 = vadd.f32 %v733_v11, %v718_v26  ;;  %v719_v33 = vsel %vm2278_vm13, %v1893_v27, 0.0  ;;  %v727_v34 = vadd.f32 %v726_v23, %v712_v31  ;;  %vm2280_vm13 = vcmp.eq.s32.totalorder %v1879_v22, %v1787_v58 }
 0x1e6   :  { %v721_v40 = vsel %vm2280_vm13, %v1897_v29, 0.0  ;;  %v802_v11 = vmul.f32 30.0, %v1819_v60  ;;  %v804_v31 = vmul.f32 30.0, %v1821_v61 }
 0x1e7   :  { %v735_v36 = vadd.f32 %v734_v32, %v719_v33  ;;  %v728_v38 = vadd.f32 %v727_v34, %v713_v35 }
 0x1e9   :  { %v736_v39 = vadd.f32 %v735_v36, %v720_v37  ;;  %729 = vadd.xlane.f32.xlu0 %v728_v38  ;;  %v798_v36 = vmul.f32 30.0, %v1855_v14  ;;  %v800_v38 = vmul.f32 30.0, %v1859_v15  ;;  %v807_v14 = vmul.f32 30.0, %v1893_v27 }
 0x1eb   :  { %v737_v41 = vadd.f32 %v736_v39, %v721_v40  ;;  %v801_v39 = vmul.f32 30.0, %v1872_v19  ;;  %v809_v40 = vmul.f32 30.0, %v1897_v29 }
 0x1ed   :  { %738 = vadd.xlane.f32.xlu1 %v737_v41 }
 0x276   :  { %v730_v43 = vpop.xlane.xlu0 %729 }
 0x277   :  { %v748_v44 = vmul.f32 %v730_v43, %v730_v43  ;;  %v1181_v55 = vadd.f32 0.9800666, %v730_v43  ;;  %v770_v21 = vmul.f32 0.9800666, %v730_v43  ;;  %v1183_v33 = vadd.f32 -0.039733864, %v730_v43 }
 0x278   :  { %v806_v43 = vmul.f32 30.0, %v1881_v24  ;;  %v817_v24 = vsel %vm793_vm0, %v801_v39, -1e+30 }
 0x279   :  { %v750_v46 = vsub.f32 1.0, %v748_v44  ;;  %vm778_vm6 = vcmp.gt.f32.partialorder %v1181_v55, 0.0 }
 0x27a   :  { %v739_v47 = vpop.xlane.xlu1 %738 }
 0x27b   :  { %v749_v48 = vmul.f32 %v739_v47, %v739_v47  ;;  %v752_v54 = vmax.f32 %v750_v46, 0.0  ;;  %v1182_v35 = vadd.f32 0.9800666, %v739_v47  ;;  %v771_v3 = vmul.f32 0.9800666, %v739_v47 }
 0x27c   :  { %v1184_v44 = vadd.f32 -0.039733864, %v739_v47  ;;  %v808_v46 = vmul.f32 30.0, %v1885_v25  ;;  %v825_v25 = vsel %vm793_vm0, %v809_v40, -1e+30  ;;  %vm2000_vm0 = vmand %vm741_vm12, %vm745_vm8  ;;  %vm2297_vm8 = vcmp.eq.s32.totalorder %v1850_v12, %v1787_v58 }
 0x27d   :  { %v751_v56 = vsub.f32 1.0, %v749_v48  ;;  %v754_v0 = vmin.f32 %v752_v54, 1.0  ;;  %vm2301_vm12 = vcmask 7168  }
 0x27f   :  { %v753_v57 = vmax.f32 %v751_v56, 0.0  ;;  %1462 = vrsqrt.f32 %v754_v0  ;;  %vm758_vm13 = vcmp.eq.f32.partialorder %v754_v0, inf  ;;  %v761_v9 = vand.u32 2147483648, %v754_v0 }
 0x280   :  { %vm760_vm14 = vcmp.eq.f32.partialorder %v754_v0, 0.0 }
 0x281   :  { %v755_v62 = vmin.f32 %v753_v57, 1.0 }
 0x283   :  { %1464 = vrsqrt.f32 %v755_v62  ;;  %vm765_vm7 = vcmp.eq.f32.partialorder %v755_v62, inf  ;;  %v768_v26 = vand.u32 2147483648, %v755_v62 }
 0x289   :  { %v1463_v63 = vpop.eup %1462 }
 0x28a   :  { %v757_v7 = vmul.f32 %v1463_v63, %v754_v0 }
 0x28c   :  { %v759_v16 = vsel %vm758_vm13, %v754_v0, %v757_v7  ;;  %vm767_vm13 = vcmp.eq.f32.partialorder %v755_v62, 0.0 }
 0x28d   :  { %v1465_v2 = vpop.eup %1464  ;;  %v762_v53 = vsel %vm760_vm14, %v761_v9, %v759_v16  ;;  %vm2302_vm14 = vmmov %vm2301_vm12 }
 0x28e   :  { %v764_v20 = vmul.f32 %v1465_v2, %v755_v62  ;;  %v772_v23 = vmul.f32 0.19866933, %v762_v53  ;;  %v957_v2 = vld [vmem:[#allocation5] sm:$0xff] }
 0x290   :  { %v766_v60 = vsel %vm765_vm7, %v755_v62, %v764_v20  ;;  %v774_v32 = vsub.f32 %v770_v21, %v772_v23  ;;  %vm779_vm7 = vcmp.gt.f32.partialorder %v1182_v35, 0.0 }
 0x291   :  { %v769_v34 = vsel %vm767_vm13, %v768_v26, %v766_v60  ;;  %vm2304_vm13 = vmmov %vm2301_vm12 }
 0x292   :  { %v773_v37 = vmul.f32 0.19866933, %v769_v34  ;;  %v782_v61 = vsel %vm778_vm6, %v774_v32, %v1183_v33  ;;  %vm2295_vm6 = vcmp.eq.s32.totalorder %v1866_v17, %v1772_v50 }
 0x293   :  { %v784_v41 = vmul.f32 30.0, %v782_v61 }
 0x294   :  { %v775_v42 = vsub.f32 %v771_v3, %v773_v37  ;;  %v1652_v3 = vmov -1e+30  }
 0x295   :  { %v1953_v15 = vsel %vm690_vm1, %v784_v41, %v794_v6  ;;  %v1958_v18 = vsel %vm691_vm2, %v784_v41, %v795_v5  ;;  %v1963_v19 = vsel %vm692_vm3, %v784_v41, %v796_v8  ;;  %v1972_v29 = vsel %vm693_vm5, %v784_v41, %v797_v10  ;;  %vm1978_vm1 = vmand %vm740_vm15, %vm744_vm11  ;;  %v958_v10 = vld [vmem:[#allocation5 + $0x8] sm:$0xff]  ;;  %87 = vst.msk [vmem:[#allocation3 + $0x8] sm:$0xff] %vm2304_vm13, %v1652_v3 }
 0x296   :  { %v783_v48 = vsel %vm779_vm7, %v775_v42, %v1184_v44  ;;  %v1985_v54 = vsel %vm694_vm9, %v784_v41, %v798_v36  ;;  %v1990_v56 = vsel %vm695_vm10, %v784_v41, %v799_v4  ;;  %v844_v0 = vmax.f32 %v1953_v15, %v1963_v19  ;;  %vm2303_vm15 = vmmov %vm2301_vm12 }
 0x297   :  { %v785_v27 = vmul.f32 30.0, %v783_v48  ;;  %v845_v28 = vmax.f32 %v1958_v18, %v1972_v29  ;;  %vm2292_vm2 = vcmp.eq.s32.totalorder %v1775_v51, %v1787_v58  ;;  %vm2293_vm3 = vcmp.eq.s32.totalorder %v1778_v52, %v1787_v58  ;;  %86 = vst.msk [vmem:[#allocation3] sm:$0xff] %vm2303_vm15, %v1652_v3  ;;  %vm2305_vm7 = vmmov %vm2301_vm12 }
 0x298   :  { %vm2294_vm5 = vcmp.eq.s32.totalorder %v1785_v45, %v1787_v58  ;;  %v2027_v7 = vsel %vm2295_vm6, %v784_v41, %v800_v38  ;;  %v846_v5 = vmax.f32 %v844_v0, %v1985_v54  ;;  %vm2298_vm9 = vcmp.eq.s32.totalorder %v1853_v13, %v1787_v58 }
 0x299   :  { %v2007_v62 = vsel %vm698_vm4, %v785_v27, %v802_v11  ;;  %v2012_v63 = vsel %vm2292_vm2, %v785_v27, %v803_v59  ;;  %v2017_v6 = vsel %vm2293_vm3, %v785_v27, %v804_v31  ;;  %v2022_v30 = vsel %vm2294_vm5, %v785_v27, %v805_v1 }
 0x29a   :  { %vm2296_vm4 = vcmp.eq.s32.totalorder %v1879_v22, %v1772_v50  ;;  %v847_v9 = vmax.f32 %v845_v28, %v1990_v56  ;;  %v2039_v11 = vsel %vm2297_vm8, %v785_v27, %v806_v43  ;;  %v2044_v16 = vsel %vm2298_vm9, %v785_v27, %v807_v14  ;;  %vm2306_vm8 = vmmov %vm2305_vm7 }
 0x29b   :  { %v2032_v8 = vsel %vm2296_vm4, %v784_v41, %v817_v24  ;;  %v853_v50 = vmax.f32 %v2007_v62, %v2017_v6  ;;  %v854_v59 = vmax.f32 %v2012_v63, %v2022_v30  ;;  %v848_v53 = vmax.f32 %v846_v5, %v2027_v7 }
 0x29c   :  { %v849_v55 = vmax.f32 %v847_v9, %v2032_v8  ;;  %v959_v20 = vsel %vm1978_vm1, %v784_v41, 0.0  ;;  %v960_v21 = vsel %vm2000_vm0, %v785_v27, 0.0  ;;  %vm2299_vm10 = vcmp.eq.s32.totalorder %v1866_v17, %v1787_v58  ;;  %v2082_v39 = vld [vmem:[#allocation3 + $0x8] sm:$0xff] }
 0x29d   :  { %v855_v23 = vmax.f32 %v853_v50, %v2039_v11  ;;  %v856_v26 = vmax.f32 %v854_v59, %v2044_v16  ;;  %v961_v31 = vadd.f32 %v959_v20, %v957_v2  ;;  %v962_v1 = vadd.f32 %v960_v21, %v958_v10 }
 0x29e   :  { %v850_v60 = vmax.f32 %v848_v53, %v849_v55  ;;  %v2061_v32 = vsel %vm2299_vm10, %v785_v27, %v808_v46  ;;  %vm2300_vm11 = vcmp.eq.s32.totalorder %v1879_v22, %v1787_v58  ;;  %v2074_v37 = vld [vmem:[#allocation3] sm:$0xff] }
 0x29f   :  { %v2066_v33 = vsel %vm2300_vm11, %v785_v27, %v825_v25  ;;  %v857_v34 = vmax.f32 %v855_v23, %v2061_v32  ;;  %963 = vst.msk [vmem:[#allocation5] sm:$0xff] %vm2301_vm12, %v961_v31 }
 0x2a0   :  { %v858_v35 = vmax.f32 %v856_v26, %v2066_v33  ;;  %964 = vst.msk [vmem:[#allocation5 + $0x8] sm:$0xff] %vm2302_vm14, %v962_v1  ;;  %851 = vmax.xlane.f32.xlu0 %v850_v60 }
 0x2a2   :  { %v859_v36 = vmax.f32 %v857_v34, %v858_v35 }
 0x2a4   :  { %860 = vmax.xlane.f32.xlu0 %v859_v36 }
 0x32d   :  { %v2076_v58 = vpop.xlane.xlu0 %851 }
 0x32e   :  { %v2080_v38 = vmax.f32 %v2074_v37, %v2076_v58  ;;  %vm965_vm2 = vcmp.ge.f32.partialorder %v1953_v15, %v2076_v58  ;;  %vm966_vm6 = vcmp.ge.f32.partialorder %v1958_v18, %v2076_v58  ;;  %vm967_vm4 = vcmp.ge.f32.partialorder %v1963_v19, %v2076_v58 }
 0x32f   :  { %vm968_vm11 = vcmp.ge.f32.partialorder %v1972_v29, %v2076_v58  ;;  %v981_v14 = vsel %vm965_vm2, %v1770_v49, 1073741824  ;;  %v982_v48 = vsel %vm966_vm6, %v1775_v51, 1073741824  ;;  %v983_v24 = vsel %vm967_vm4, %v1778_v52, 1073741824 }
 0x330   :  { %v864_v40 = vsub.f32 %v2074_v37, %v2080_v38  ;;  %955 = vst.msk [vmem:[#allocation3] sm:$0xff] %vm2305_vm7, %v2080_v38  ;;  %876 = vperm.xlu0 %1457, %v2080_v38   ;;  %v984_v25 = vsel %vm968_vm11, %v1785_v45, 1073741824  ;;  %vm971_vm11 = vcmp.ge.f32.partialorder %v2027_v7, %v2076_v58 }
 0x331   :  { %v2089_v61 = vpop.xlane.xlu0 %860  ;;  %vm999_vm2 = vcmp.lt.s32.totalorder %v982_v48, %v984_v25  ;;  %v987_v55 = vsel %vm971_vm11, %v1866_v17, 1073741824 }
 0x332   :  { %v2093_v4 = vmax.f32 %v2082_v39, %v2089_v61  ;;  %vm973_vm1 = vcmp.ge.f32.partialorder %v2007_v62, %v2089_v61  ;;  %vm974_vm0 = vcmp.ge.f32.partialorder %v2012_v63, %v2089_v61  ;;  %vm975_vm3 = vcmp.ge.f32.partialorder %v2017_v6, %v2089_v61 }
 0x333   :  { %vm976_vm5 = vcmp.ge.f32.partialorder %v2022_v30, %v2089_v61  ;;  %vm977_vm9 = vcmp.ge.f32.partialorder %v2039_v11, %v2089_v61  ;;  %vm978_vm10 = vcmp.ge.f32.partialorder %v2044_v16, %v2089_v61  ;;  %v989_v42 = vsel %vm973_vm1, %v1770_v49, 1073741824 }
 0x334   :  { %881 = vperm.xlu1 %1456, %v2093_v4   ;;  %v865_v41 = vsub.f32 %v2082_v39, %v2093_v4  ;;  %956 = vst.msk [vmem:[#allocation3 + $0x8] sm:$0xff] %vm2306_vm8, %v2093_v4  ;;  %v990_v44 = vsel %vm974_vm0, %v1775_v51, 1073741824  ;;  %v991_v43 = vsel %vm975_vm3, %v1778_v52, 1073741824  ;;  %v992_v46 = vsel %vm976_vm5, %v1785_v45, 1073741824 }
 0x335   :  { %vm1025_vm12 = vcmp.lt.s32.totalorder %v989_v42, %v991_v43  ;;  %vm1027_vm14 = vcmp.lt.s32.totalorder %v990_v44, %v992_v46  ;;  %v993_v27 = vsel %vm977_vm9, %v1850_v12, 1073741824  ;;  %v994_v47 = vsel %vm978_vm10, %v1853_v13, 1073741824 }
 0x336   :  { %v1026_v0 = vsel %vm1025_vm12, %v989_v42, %v991_v43  ;;  %v1028_v28 = vsel %vm1027_vm14, %v990_v44, %v992_v46  ;;  %vm979_vm15 = vcmp.ge.f32.partialorder %v2061_v32, %v2089_v61  ;;  %vm980_vm13 = vcmp.ge.f32.partialorder %v2066_v33, %v2089_v61 }
 0x337   :  { %vm1029_vm7 = vcmp.lt.s32.totalorder %v1026_v0, %v993_v27  ;;  %vm1031_vm1 = vcmp.lt.s32.totalorder %v1028_v28, %v994_v47  ;;  %vm997_vm0 = vcmp.lt.s32.totalorder %v981_v14, %v983_v24  ;;  %v995_v52 = vsel %vm979_vm15, %v1866_v17, 1073741824 }
 0x338   :  { %v1030_v49 = vsel %vm1029_vm7, %v1026_v0, %v993_v27  ;;  %v1032_v51 = vsel %vm1031_vm1, %v1028_v28, %v994_v47  ;;  %v996_v45 = vsel %vm980_vm13, %v1879_v22, 1073741824  ;;  %vm969_vm3 = vcmp.ge.f32.partialorder %v1985_v54, %v2076_v58 }
 0x339   :  { %vm970_vm5 = vcmp.ge.f32.partialorder %v1990_v56, %v2076_v58  ;;  %vm1033_vm6 = vcmp.lt.s32.totalorder %v1030_v49, %v995_v52  ;;  %vm1035_vm4 = vcmp.lt.s32.totalorder %v1032_v51, %v996_v45  ;;  %v998_v57 = vsel %vm997_vm0, %v981_v14, %v983_v24 }
 0x33a   :  { %v1000_v5 = vsel %vm999_vm2, %v982_v48, %v984_v25  ;;  %vm1053_vm8 = vcmp.gt.f32.partialorder %v2076_v58, %v2074_v37  ;;  %v985_v9 = vsel %vm969_vm3, %v1850_v12, 1073741824  ;;  %v986_v2 = vsel %vm970_vm5, %v1853_v13, 1073741824 }
 0x33b   :  { %v1034_v10 = vsel %vm1033_vm6, %v1030_v49, %v995_v52  ;;  %v1036_v50 = vsel %vm1035_vm4, %v1032_v51, %v996_v45  ;;  %vm1001_vm9 = vcmp.lt.s32.totalorder %v998_v57, %v985_v9  ;;  %vm1003_vm10 = vcmp.lt.s32.totalorder %v1000_v5, %v986_v2 }
 0x33c   :  { %vm972_vm12 = vcmp.ge.f32.partialorder %v2032_v8, %v2076_v58  ;;  %vm1037_vm14 = vcmp.lt.s32.totalorder %v1034_v10, %v1036_v50  ;;  %v1002_v59 = vsel %vm1001_vm9, %v998_v57, %v985_v9  ;;  %v1004_v53 = vsel %vm1003_vm10, %v1000_v5, %v986_v2 }
 0x33d   :  { %v988_v20 = vsel %vm972_vm12, %v1879_v22, 1073741824  ;;  %v2150_v12 = vsel %vm1037_vm14, %v1034_v10, %v1036_v50  ;;  %vm1005_vm15 = vcmp.lt.s32.totalorder %v1002_v59, %v987_v55  ;;  %vm1054_vm2 = vcmp.gt.f32.partialorder %v2089_v61, %v2082_v39 }
 0x33e   :  { %vm1007_vm13 = vcmp.lt.s32.totalorder %v1004_v53, %v988_v20  ;;  %v1040_v13 = vshra.s32 %v2150_v12, 16  ;;  %v1006_v21 = vsel %vm1005_vm15, %v1002_v59, %v987_v55  ;;  %vm2307_vm3 = vcmask 7168  }
 0x33f   :  { %v1008_v23 = vsel %vm1007_vm13, %v1004_v53, %v988_v20  ;;  %vm2308_vm5 = vmmov %vm2307_vm3 }
 0x340   :  { %vm1009_vm7 = vcmp.lt.s32.totalorder %v1006_v21, %v1008_v23  ;;  %v2153_v26 = vcvt.s32.f32 %v1040_v13  ;;  %vm2309_vm6 = vmmov %vm2307_vm3 }
 0x341   :  { %v2156_v31 = vsel %vm1009_vm7, %v1006_v21, %v1008_v23  ;;  %v1039_v23 = vand.u32 65535, %v2150_v12  ;;  %vm2310_vm4 = vmmov %vm2307_vm3 }
 0x342   :  { %v1012_v1 = vshra.s32 %v2156_v31, 16  ;;  %v1011_v12 = vand.u32 65535, %v2156_v31  ;;  %v1093_v31 = vld [vmem:[#allocation5 + $0x8] sm:$0xff] }
 0x344   :  { %v2159_v17 = vcvt.s32.f32 %v1012_v1 }
 0x34f   :  { %1043 = vmin.xlane.f32.xlu0 %v2153_v26 }
 0x358   :  { %1015 = vmin.xlane.f32.xlu1 %v2159_v17 }
 0x3af   :  { %v877_v3 = vpop.permute.xlu0 %876 }
 0x3b0   :  { %v884_v44 = vsub.f32 %v1953_v15, %v877_v3  ;;  %v885_v43 = vsub.f32 %v1958_v18, %v877_v3  ;;  %v886_v25 = vsub.f32 %v1963_v19, %v877_v3  ;;  %v887_v18 = vsub.f32 %v1972_v29, %v877_v3 }
 0x3b1   :  { %v888_v19 = vsub.f32 %v1985_v54, %v877_v3  ;;  %v889_v29 = vsub.f32 %v1990_v56, %v877_v3  ;;  %v890_v59 = vsub.f32 %v2027_v7, %v877_v3  ;;  %v891_v13 = vsub.f32 %v2032_v8, %v877_v3 }
 0x3b2   :  { %v900_v48 = vmul.f32 1.442695, %v884_v44  ;;  %v902_v24 = vmul.f32 1.442695, %v885_v43 }
 0x3b3   :  { %v882_v22 = vpop.permute.xlu1 %881  ;;  %v908_v9 = vmul.f32 1.442695, %v888_v19  ;;  %v910_v54 = vmul.f32 1.442695, %v889_v29  ;;  %v912_v56 = vmul.f32 1.442695, %v890_v59 }
 0x3b4   :  { %v892_v60 = vsub.f32 %v2007_v62, %v882_v22  ;;  %v893_v34 = vsub.f32 %v2012_v63, %v882_v22  ;;  %v894_v42 = vsub.f32 %v2017_v6, %v882_v22  ;;  %v895_v46 = vsub.f32 %v2022_v30, %v882_v22 }
 0x3b5   :  { %v896_v63 = vsub.f32 %v2039_v11, %v882_v22  ;;  %v897_v15 = vsub.f32 %v2044_v16, %v882_v22  ;;  %v904_v30 = vmul.f32 1.442695, %v886_v25  ;;  %v898_v28 = vsub.f32 %v2061_v32, %v882_v22 }
 0x3b6   :  { %v916_v35 = vmul.f32 1.442695, %v892_v60  ;;  %v918_v36 = vmul.f32 1.442695, %v893_v34  ;;  %v920_v14 = vmul.f32 1.442695, %v894_v42  ;;  %v899_v57 = vsub.f32 %v2066_v33, %v882_v22 }
 0x3b7   :  { %v922_v62 = vmul.f32 1.442695, %v895_v46  ;;  %v924_v47 = vmul.f32 1.442695, %v896_v63  ;;  %v926_v49 = vmul.f32 1.442695, %v897_v15  ;;  %v1013_v63 = vcvt.s32.f32 %v1011_v12 }
 0x3b8   :  { %1466 = vpow2.f32 %v916_v35  ;;  %v906_v11 = vmul.f32 1.442695, %v887_v18  ;;  %v928_v16 = vmul.f32 1.442695, %v898_v28  ;;  %v930_v10 = vmul.f32 1.442695, %v899_v57 }
 0x3b9   :  { %1468 = vpow2.f32 %v918_v36  ;;  %v914_v34 = vmul.f32 1.442695, %v891_v13  ;;  %v1041_v36 = vcvt.s32.f32 %v1039_v23  ;;  %v1064_v15 = vld [vmem:[#allocation3] sm:$0xff]  ;;  %v1065_v18 = vld [vmem:[#allocation3 + $0x8] sm:$0xff] }
 0x3ba   :  { %1470 = vpow2.f32 %v920_v14 }
 0x3bb   :  { %1472 = vpow2.f32 %v900_v48 }
 0x3bc   :  { %1474 = vpow2.f32 %v902_v24 }
 0x3bd   :  { %1476 = vpow2.f32 %v922_v62 }
 0x3be   :  { %1478 = vpow2.f32 %v924_v47  ;;  %v1092_v47 = vld [vmem:[#allocation5] sm:$0xff] }
 0x3bf   :  { %1480 = vpow2.f32 %v904_v30  ;;  %v868_v30 = vmul.f32 1.442695, %v865_v41 }
 0x3c0   :  { %1482 = vpow2.f32 %v926_v49 }
 0x3c1   :  { %1484 = vpow2.f32 %v906_v11  ;;  %v871_v11 = vld [vmem:[#allocation4 + $0x8] sm:$0xff] }
 0x3c2   :  { %v1467_v27 = vpop.eup %1466  ;;  %1486 = vpow2.f32 %v928_v16 }
 0x3c3   :  { %v1469_v6 = vpop.eup %1468  ;;  %1488 = vpow2.f32 %v908_v9  ;;  %v870_v9 = vld [vmem:[#allocation4] sm:$0xff] }
 0x3c4   :  { %v941_v0 = vadd.f32 %v1469_v6, %v1467_v27  ;;  %v1471_v51 = vpop.eup %1470  ;;  %1490 = vpow2.f32 %v930_v10  ;;  %v1055_v10 = vld [vmem:[#allocation6] sm:$0xff] }
 0x3c5   :  { %v1473_v45 = vpop.eup %1472  ;;  %1492 = vpow2.f32 %v910_v54 }
 0x3c6   :  { %v942_v52 = vadd.f32 %v1471_v51, %v941_v0  ;;  %v1475_v5 = vpop.eup %1474  ;;  %1494 = vpow2.f32 %v912_v56 }
 0x3c7   :  { %v1477_v2 = vpop.eup %1476  ;;  %v932_v50 = vadd.f32 %v1475_v5, %v1473_v45  ;;  %1496 = vpow2.f32 %v914_v34 }
 0x3c8   :  { %v943_v32 = vadd.f32 %v1477_v2, %v942_v52  ;;  %v1479_v53 = vpop.eup %1478  ;;  %1498 = vpow2.f32 %v868_v30  ;;  %v1056_v52 = vld [vmem:[#allocation6 + $0x8] sm:$0xff] }
 0x3c9   :  { %v1481_v55 = vpop.eup %1480 }
 0x3ca   :  { %v944_v20 = vadd.f32 %v1479_v53, %v943_v32  ;;  %v933_v33 = vadd.f32 %v1481_v55, %v932_v50  ;;  %v1483_v21 = vpop.eup %1482 }
 0x3cb   :  { %v1485_v1 = vpop.eup %1484 }
 0x3cc   :  { %v945_v22 = vadd.f32 %v1483_v21, %v944_v20  ;;  %v934_v60 = vadd.f32 %v1485_v1, %v933_v33  ;;  %v1487_v7 = vpop.eup %1486 }
 0x3cd   :  { %v1489_v42 = vpop.eup %1488 }
 0x3ce   :  { %v946_v44 = vadd.f32 %v1487_v7, %v945_v22  ;;  %v935_v46 = vadd.f32 %v1489_v42, %v934_v60  ;;  %v1491_v8 = vpop.eup %1490 }
 0x3cf   :  { %v1493_v3 = vpop.eup %1492 }
 0x3d0   :  { %v947_v14 = vadd.f32 %v1491_v8, %v946_v44  ;;  %v936_v48 = vadd.f32 %v1493_v3, %v935_v46  ;;  %v1495_v24 = vpop.eup %1494 }
 0x3d2   :  { %v937_v25 = vadd.f32 %v1495_v24, %v936_v48 }
 0x3dc   :  { %v1044_v35 = vpop.xlane.xlu0 %1043 }
 0x3dd   :  { %vm1045_vm1 = vcmp.eq.f32.partialorder %v2153_v26, %v1044_v35  ;;  %v1497_v26 = vpop.eup %1496  ;;  %v1050_v0 = vcvt.f32.s32 %v1044_v35 }
 0x3de   :  { %v1046_v43 = vsel %vm1045_vm1, %v1041_v36, inf  ;;  %v938_v6 = vadd.f32 %v1497_v26, %v937_v25  ;;  %v1499_v28 = vpop.eup %1498 }
 0x3df   :  { %1047 = vmin.xlane.f32.xlu1 %v1046_v43  ;;  %v1051_v19 = vshll.u32 %v1050_v0, 16  ;;  %v873_v57 = vmul.f32 %v1499_v28, %v871_v11 }
 0x3e3   :  { %948 = vadd.xlane.f32.xlu1 %v947_v14 }
 0x3e5   :  { %v1016_v62 = vpop.xlane.xlu1 %1015 }
 0x3e6   :  { %vm1017_vm0 = vcmp.eq.f32.partialorder %v2159_v17, %v1016_v62  ;;  %v866_v17 = vmul.f32 1.442695, %v864_v40  ;;  %v1022_v5 = vcvt.f32.s32 %v1016_v62 }
 0x3e7   :  { %v1018_v27 = vsel %vm1017_vm0, %v1013_v63, inf }
 0x3e8   :  { %1019 = vmin.xlane.f32.xlu0 %v1018_v27  ;;  %1500 = vpow2.f32 %v866_v17  ;;  %v1023_v2 = vshll.u32 %v1022_v5, 16 }
 0x3ec   :  { %939 = vadd.xlane.f32.xlu0 %v938_v6 }
 0x3f2   :  { %v1501_v40 = vpop.eup %1500 }
 0x3f3   :  { %v872_v54 = vmul.f32 %v1501_v40, %v870_v9 }
 0x3f4   :  { %1068 = vperm.xlu1 %1456, %v1064_v15  }
 0x3f8   :  { %1096 = vperm.xlu1 %1456, %v1092_v47  }
 0x402   :  { %1073 = vperm.xlu0 %1457, %v1065_v18  }
 0x406   :  { %1101 = vperm.xlu0 %1457, %v1093_v31  }
 0x46c   :  { %v1048_v49 = vpop.xlane.xlu1 %1047 }
 0x46d   :  { %v1049_v51 = vcvt.f32.s32 %v1048_v49 }
 0x46f   :  { %v1052_v45 = vadd.s32 %v1051_v19, %v1049_v51 }
 0x470   :  { %v949_v4 = vpop.xlane.xlu1 %948 }
 0x471   :  { %v1058_v41 = vsel %vm1054_vm2, %v1052_v45, %v1056_v52  ;;  %v951_v16 = vadd.f32 %v949_v4, %v873_v57 }
 0x472   :  { %1060 = vst.msk [vmem:[#allocation6 + $0x8] sm:$0xff] %vm2307_vm3, %v1058_v41 }
 0x473   :  { %954 = vst.msk [vmem:[#allocation4 + $0x8] sm:$0xff] %vm2308_vm5, %v951_v16 }
 0x474   :  { %v1069_v38 = vpop.permute.xlu1 %1068 }
 0x475   :  { %1076 = vst [vmem:[#allocation12] sm:$0xff] %v1069_v38  ;;  %v1020_v29 = vpop.xlane.xlu0 %1019 }
 0x476   :  { %v1021_v32 = vcvt.f32.s32 %v1020_v29 }
 0x478   :  { %v1024_v50 = vadd.s32 %v1023_v2, %v1021_v32  ;;  %v1097_v59 = vpop.permute.xlu1 %1096 }
 0x479   :  { %1104 = vst [vmem:[#allocation15] sm:$0xff] %v1097_v59  ;;  %v940_v39 = vpop.xlane.xlu0 %939  ;;  %v1107_v21 = vld [vmem:[#allocation6 + $0x8] sm:$0xff] }
 0x47a   :  { %v1057_v61 = vsel %vm1053_vm8, %v1024_v50, %v1055_v10  ;;  %v950_v53 = vadd.f32 %v940_v39, %v872_v54  ;;  %v1079_v55 = vld [vmem:[#allocation4 + $0x8] sm:$0xff] }
 0x47b   :  { %1059 = vst.msk [vmem:[#allocation6] sm:$0xff] %vm2309_vm6, %v1057_v61  ;;  %1087 = vperm.xlu1 %1456, %v1079_v55  }
 0x47c   :  { %953 = vst.msk [vmem:[#allocation4] sm:$0xff] %vm2310_vm4, %v950_v53 }
 0x481   :  { %v1074_v20 = vpop.permute.xlu0 %1073 }
 0x482   :  { %1077 = vst [vmem:[#allocation12 + $0x8] sm:$0xff] %v1074_v20  ;;  %v1106_v33 = vld [vmem:[#allocation6] sm:$0xff] }
 0x483   :  { %1109 = vperm.xlu1 %1456, %v1106_v33   ;;  %v1078_v13 = vld [vmem:[#allocation4] sm:$0xff] }
 0x484   :  { %1082 = vperm.xlu0 %1457, %v1078_v13  }
 0x485   :  { %v1102_v56 = vpop.permute.xlu0 %1101 }
 0x486   :  { %1105 = vst [vmem:[#allocation15 + $0x8] sm:$0xff] %v1102_v56 }
 0x488   :  { %1112 = vperm.xlu0 %1457, %v1107_v21  }
 0x489   :  { %1557 = shalt.err (!%p1554_p6)
}
 0x48a   :  { %s1558_s7 = scalar_lea.hbm %s2274_s3, 256 }
 0x48b   :  { %p1559_p7 = scmp.ne.s32.totalorder %s2274_s3, %s1558_s7  ;;  %p1562_p8 = scmp.lt.u32.totalorder %s1558_s7, %s2274_s3 }
 0x48d   :  { %p1564_p9 = pnand %p1562_p8, %p1559_p7 }
 0x48f   :  { %1567 = shalt.err (!%p1564_p9)
}
 0x490   :  { %s1654_s12 = smov 128   ;;  %s1655_s13 = smov 8  }
 0x491   :  { %1127 = dma.vmem_to_hbm [thread:$0]  %s1122_s27, 256, %s2274_s3, [#allocation9], %s1654_s12, %s1654_s12, %s1655_s13  }
 0x492   :  { %s1656_s16 = smov [#allocation13]   ;;  %s1657_s18 = smov [#allocation15]  }
 0x493   :  { %s1133_s17 = sshll.u32 %s1656_s16, 4  ;;  %s1145_s19 = sshll.u32 %s1657_s18, 4  ;;  %s1134_s17 = int_to_ptr.vmem [resolvable:$true] %s1133_s17  ;;  %s2212_s19 = int_to_ptr.vmem [resolvable:$true] %s1145_s19 }
 0x494   :  { %s1658_s20 = smov [#allocation16]   ;;  %s1568_s21 = scalar_lea.vmem %s1134_s17, 256 }
 0x495   :  { %s1157_s0 = sshll.u32 %s1658_s20, 4  ;;  %p1569_p10 = scmp.ne.s32.totalorder %s1134_s17, %s1568_s21  ;;  %s2214_s0 = int_to_ptr.vmem [resolvable:$true] %s1157_s0 }
 0x496   :  { %p1573_p11 = scmp.lt.s32.totalorder %s1134_s17, %s1134_s17  ;;  %p1574_p12 = scmp.lt.s32.totalorder %s1568_s21, %s1568_s21 }
 0x498   :  { %p1575_p13 = por %p1574_p12, %p1573_p11 }
 0x49a   :  { %p1576_p0 = pnand %p1575_p13, %p1569_p10 }
 0x4fa   :  { %v1088_v37 = vpop.permute.xlu1 %1087 }
 0x4fb   :  { %1091 = vst [vmem:[#allocation13 + $0x8] sm:$0xff] %v1088_v37 }
 0x502   :  { %v1110_v58 = vpop.permute.xlu1 %1109 }
 0x503   :  { %1114 = vst [vmem:[#allocation16] sm:$0xff] %v1110_v58  ;;  %v1083_v23 = vpop.permute.xlu0 %1082 }
 0x504   :  { %1090 = vst [vmem:[#allocation13] sm:$0xff] %v1083_v23 }
 0x505   :  { %1579 = shalt.err (!%p1576_p0)
}
 0x506   :  { %s1580_s23 = scalar_lea.hbm %s2275_s4, 256 }
 0x507   :  { %p1581_p1 = scmp.ne.s32.totalorder %s2275_s4, %s1580_s23  ;;  %p1584_p2 = scmp.lt.u32.totalorder %s1580_s23, %s2275_s4 }
 0x509   :  { %p1586_p3 = pnand %p1584_p2, %p1581_p1 }
 0x50b   :  { %1589 = shalt.err (!%p1586_p3)
}
 0x50c   :  { %1139 = dma.vmem_to_hbm [thread:$0]  %s1134_s17, 256, %s2275_s4, [#allocation14], %s1654_s12, %s1654_s12, %s1655_s13  }
 0x50d   :  { %s1590_s28 = scalar_lea.vmem %s2212_s19, 256  ;;  %p1595_p5 = scmp.lt.s32.totalorder %s2212_s19, %s2212_s19 }
 0x50e   :  { %p1591_p4 = scmp.ne.s32.totalorder %s2212_s19, %s1590_s28  ;;  %p1596_p6 = scmp.lt.s32.totalorder %s1590_s28, %s1590_s28 }
 0x510   :  { %p1597_p7 = por %p1596_p6, %p1595_p5 }
 0x512   :  { %p1598_p8 = pnand %p1597_p7, %p1591_p4 }
 0x514   :  { %1601 = shalt.err (!%p1598_p8)
}
 0x515   :  { %s1602_s7 = scalar_lea.hbm %s2276_s5, 256 }
 0x516   :  { %p1603_p9 = scmp.ne.s32.totalorder %s2276_s5, %s1602_s7  ;;  %p1606_p10 = scmp.lt.u32.totalorder %s1602_s7, %s2276_s5 }
 0x518   :  { %p1608_p11 = pnand %p1606_p10, %p1603_p9 }
 0x51a   :  { %1611 = shalt.err (!%p1608_p11)
}
 0x51b   :  { %1151 = dma.vmem_to_hbm [thread:$0]  %s2212_s19, 256, %s2276_s5, [#allocation14], %s1654_s12, %s1654_s12, %s1655_s13   ;;  %v1113_v1 = vpop.permute.xlu0 %1112 }
 0x51c   :  { %1115 = vst [vmem:[#allocation16 + $0x8] sm:$0xff] %v1113_v1  ;;  %s1612_s15 = scalar_lea.vmem %s2214_s0, 256  ;;  %p1617_p13 = scmp.lt.s32.totalorder %s2214_s0, %s2214_s0 }
 0x51d   :  { %p1613_p12 = scmp.ne.s32.totalorder %s2214_s0, %s1612_s15  ;;  %p1618_p0 = scmp.lt.s32.totalorder %s1612_s15, %s1612_s15 }
 0x51f   :  { %p1619_p1 = por %p1618_p0, %p1617_p13 }
 0x521   :  { %p1620_p2 = pnand %p1619_p1, %p1613_p12 }
 0x523   :  { %1623 = shalt.err (!%p1620_p2)
}
 0x524   :  { %s1624_s18 = scalar_lea.hbm %s2277_s6, 256 }
 0x525   :  { %p1625_p3 = scmp.ne.s32.totalorder %s2277_s6, %s1624_s18  ;;  %p1628_p4 = scmp.lt.u32.totalorder %s1624_s18, %s2277_s6 }
 0x527   :  { %p1630_p5 = pnand %p1628_p4, %p1625_p3 }
 0x529   :  { %1633 = shalt.err (!%p1630_p5)
}
 0x52a   :  { %1163 = dma.vmem_to_hbm [thread:$0]  %s2214_s0, 256, %s2277_s6, [#allocation17], %s1654_s12, %s1654_s12, %s1655_s13  }
 0x52b   :  { %1638 = dma.done.wait [#allocation9], 256  }
 0x52c   :  { %1639 = vsyncadd [#allocation9], 4294967040 }
 0x52d   :  { %1640 = dma.done.wait [#allocation14], 512  }
 0x52e   :  { %1641 = vsyncadd [#allocation14], 4294966784 }
 0x52f   :  { %1642 = dma.done.wait [#allocation17], 256  }
 0x530   :  { %1643 = vsyncadd [#allocation17], 4294967040 }
 0x531   :  { %1176 = vsyncpa [#allocation8], 1 }
 0x532   :  { %1177 = vsyncpa [#allocation11], 1 }
 0x533   :  { %1178 = vsyncpa [#allocation9], 1 }
 0x534   :  { %1179 = vsyncpa [#allocation14], 1 }
 0x535   :  { %1180 = vsyncpa [#allocation17], 1 }

</bundles_post_ra>
